<compile_context>
chip_gen: v7x
topology: tpu7x:2x2x1
jax: 0.10.0
libtpu: 0.0.40
codegen_flags: <defaults>
</compile_context>

<pallas_src>
import math

import jax
import jax.numpy as jnp
import numpy as np
from jax.experimental import pallas as pl
from jax.experimental.pallas import tpu as pltpu


def _bilstm_kernel(x_ref, w_ref, u_ref, b_ref, ynet_ref, yt_ref):
    # x_ref:    (S*B, D)   time-major flattened input
    # w_ref:    (D, 8H)    [w_fwd | w_bwd], gate order [i, f, c, o] per direction
    # u_ref:    (2H, 8H)   block-diagonal: u_fwd -> [0:H, 0:4H], u_bwd -> [H:2H, 4H:8H]
    # b_ref:    (1, 8H)    [b_fwd | b_bwd]
    # ynet_ref: (B, S, 2H) packed output (fwd lanes [0,H), bwd lanes [H,2H))
    # yt_ref:   (B, 2H)    final states [h_T_fwd | h_T_bwd]
    B, S, H2 = ynet_ref.shape
    H = H2 // 2
    G = 4 * H  # per-direction fused gate width

    w = w_ref[...]
    u = u_ref[...]
    b = b_ref[...]

    # --- Off-chain prologue: every input projection for both directions in one
    # MXU call (removes 2 matmuls + 2 bias adds per step from the recurrence).
    xg = jnp.dot(x_ref[...], w, preferred_element_type=jnp.float32) + b  # (S*B, 8H)

    # --- Latency-bound recurrence: one fused matmul + one fused sigmoid/step.
    h_cat = jnp.zeros((B, 2 * H), jnp.float32)   # [h_f | h_b]
    c_f = jnp.zeros((B, H), jnp.float32)
    c_b = jnp.zeros((B, H), jnp.float32)

    hs_f = []
    hs_b = []
    for t in range(S):
        # Pre-activations for this step (pure function of x -> off the chain):
        # fwd gates use x[:, t], bwd gates use x[:, S-1-t].
        pre_t = jnp.concatenate(
            [xg[t * B:(t + 1) * B, 0:G],
             xg[(S - 1 - t) * B:(S - t) * B, G:2 * G]],
            axis=1)                                                    # (B, 8H)

        # Single recurrent matmul for both directions (block-diagonal U).
        hu = jnp.dot(h_cat, u, preferred_element_type=jnp.float32)    # (B, 8H)
        g = jax.nn.sigmoid(pre_t + hu)       # [i,f,c,o]_fwd | [i,f,c,o]_bwd

        i_f = g[:, 0 * H:1 * H]
        f_f = g[:, 1 * H:2 * H]
        g_f = g[:, 2 * H:3 * H]
        o_f = g[:, 3 * H:4 * H]
        i_b = g[:, G + 0 * H:G + 1 * H]
        f_b = g[:, G + 1 * H:G + 2 * H]
        g_b = g[:, G + 2 * H:G + 3 * H]
        o_b = g[:, G + 3 * H:G + 4 * H]

        # NOTE: reproduces the module exactly (additive cell/hidden updates,
        # sigmoid on the candidate gate) -- intentional quirky math.
        c_f = f_f + c_f + i_f * g_f
        h_f = o_f + jnp.tanh(c_f)
        c_b = f_b + c_b + i_b * g_b
        h_b = o_b + jnp.tanh(c_b)

        h_cat = jnp.concatenate([h_f, h_b], axis=1)                    # (B, 2H)
        hs_f.append(h_f)
        hs_b.append(h_b)

    # --- Epilogue: all output stores after the recurrence (off the serial chain).
    # Writing the backward hidden of step t at time index S-1-t realizes
    # torch.flip(hidden_seq_b, dims=(1,)).
    for t in range(S):
        ynet_ref[:, t, 0:H] = hs_f[t]
        ynet_ref[:, t, H:2 * H] = hs_b[S - 1 - t]

    # Final states y_t = cat(h_T_fwd, h_T_bwd) == h_cat after the last step.
    yt_ref[...] = h_cat


def bilstm_forward(x, params):
    """x: [batch, seq, input] -> (y_t [batch, 2H], y_net [batch, seq, 2H])."""
    B, S, D = x.shape
    H = params["w_fwd"].shape[1] // 4

    # Tiny one-time wrapper-side prep (all KB-scale, off the kernel's chain):
    # time-major flatten of x, fused input weights/biases, block-diagonal U.
    x_tm = jnp.transpose(x, (1, 0, 2)).reshape(S * B, D)
    w_cat = jnp.concatenate([params["w_fwd"], params["w_bwd"]], axis=1)    # (D, 8H)
    b_cat = jnp.concatenate([params["b_fwd"], params["b_bwd"]], axis=1)    # (1, 8H)
    u_blk = jnp.zeros((2 * H, 8 * H), jnp.float32)
    u_blk = u_blk.at[0:H, 0:4 * H].set(params["u_fwd"])
    u_blk = u_blk.at[H:2 * H, 4 * H:8 * H].set(params["u_bwd"])            # (2H, 8H)

    vmem = pl.BlockSpec(memory_space=pltpu.MemorySpace.VMEM)
    y_net, y_t = pl.pallas_call(
        _bilstm_kernel,
        out_shape=(jax.ShapeDtypeStruct((B, S, 2 * H), jnp.float32),
                   jax.ShapeDtypeStruct((B, 2 * H), jnp.float32)),
        in_specs=[vmem] * 4,
        out_specs=(vmem, vmem),
    )(x_tm, w_cat, u_blk, b_cat)
    return y_t, y_net


def bilstm_ref(x, params):
    """Pure-JAX reference that mirrors the PyTorch forward loop exactly."""
    B, S, D = x.shape
    H = params["w_fwd"].shape[1] // 4
    hi = jax.lax.Precision.HIGHEST

    def gates(x_t, h, w, u, b):
        g = jax.nn.sigmoid(jnp.dot(x_t, w, precision=hi)
                           + jnp.dot(h, u, precision=hi) + b)
        return g[:, :H], g[:, H:2 * H], g[:, 2 * H:3 * H], g[:, 3 * H:]

    h_t = jnp.zeros((B, H), jnp.float32)
    c_t = jnp.zeros((B, H), jnp.float32)
    h_b = jnp.zeros((B, H), jnp.float32)
    c_b = jnp.zeros((B, H), jnp.float32)
    hs, hbs = [], []
    for t in range(S):
        i_t, f_t, g_t, o_t = gates(x[:, t, :], h_t,
                                   params["w_fwd"], params["u_fwd"], params["b_fwd"])
        c_t = f_t + c_t + i_t * g_t
        h_t = o_t + jnp.tanh(c_t)
        i_b, f_b, g_b, o_b = gates(x[:, S - 1 - t, :], h_b,
                                   params["w_bwd"], params["u_bwd"], params["b_bwd"])
        c_b = f_b + c_b + i_b * g_b
        h_b = o_b + jnp.tanh(c_b)
        hs.append(h_t)
        hbs.append(h_b)
    hidden_seq = jnp.stack(hs, axis=1)                    # [B, S, H]
    hidden_seq_b = jnp.flip(jnp.stack(hbs, axis=1), 1)    # [B, S, H]
    y_net = jnp.concatenate([hidden_seq, hidden_seq_b], axis=2)
    y_t = jnp.concatenate([h_t, h_b], axis=1)
    return y_t, y_net


def init_params(key, input_size, hidden_size):
    """Fused-gate layout: w [D, 4H], u [H, 4H], b [1, 4H]; gate order [i, f, c, o]."""
    stdv = 1.0 / math.sqrt(hidden_size)
    keys = jax.random.split(key, 6)

    def uni(k, shape):
        return jax.random.uniform(k, shape, jnp.float32, minval=-stdv, maxval=stdv)

    H4 = 4 * hidden_size
    return {
        "w_fwd": uni(keys[0], (input_size, H4)),
        "u_fwd": uni(keys[1], (hidden_size, H4)),
        "b_fwd": uni(keys[2], (1, H4)),
        "w_bwd": uni(keys[3], (input_size, H4)),
        "u_bwd": uni(keys[4], (hidden_size, H4)),
        "b_bwd": uni(keys[5], (1, H4)),
    }


if __name__ == "__main__":
    input_size, hidden_size, batch_size, seq_len = 16, 32, 4, 8

    key = jax.random.PRNGKey(0)
    k_param, k_x = jax.random.split(key)
    params = init_params(k_param, input_size, hidden_size)
    x = jax.random.normal(k_x, (batch_size, seq_len, input_size), jnp.float32)

    y_t, y_net = jax.jit(bilstm_forward)(x, params)
    jax.block_until_ready((y_t, y_net))

    y_t_ref, y_net_ref = bilstm_ref(x, params)
    np.testing.assert_allclose(np.asarray(y_t), np.asarray(y_t_ref), rtol=1e-5, atol=1e-5)
    np.testing.assert_allclose(np.asarray(y_net), np.asarray(y_net_ref), rtol=1e-5, atol=1e-5)

    assert y_t.shape == (batch_size, 2 * hidden_size)
    assert y_net.shape == (batch_size, seq_len, 2 * hidden_size)
    print("KERNEL_OK")
</pallas_src>

<mosaic_0001>
module attributes {stable_mosaic.version = 11 : i64} {
  func.func @_bilstm_kernel(%arg0: memref<32x16xf32, #tpu.memory_space<vmem>>, %arg1: memref<16x256xf32, #tpu.memory_space<vmem>>, %arg2: memref<64x256xf32, #tpu.memory_space<vmem>>, %arg3: memref<1x256xf32, #tpu.memory_space<vmem>>, %arg4: memref<4x8x64xf32, #tpu.memory_space<vmem>>, %arg5: memref<4x64xf32, #tpu.memory_space<vmem>>) attributes {dimension_semantics = [], scalar_prefetch = 0 : i64, scratch_operands = 0 : i64, tpu.core_type = #tpu.core_type<tc>} {
    %c0 = arith.constant 0 : index
    %c0_0 = arith.constant 0 : index
    %0 = vector.load %arg1[%c0, %c0_0] : memref<16x256xf32, #tpu.memory_space<vmem>>, vector<16x256xf32>
    %c0_1 = arith.constant 0 : index
    %c0_2 = arith.constant 0 : index
    %1 = vector.load %arg2[%c0_1, %c0_2] : memref<64x256xf32, #tpu.memory_space<vmem>>, vector<64x256xf32>
    %c0_3 = arith.constant 0 : index
    %c0_4 = arith.constant 0 : index
    %2 = vector.load %arg3[%c0_3, %c0_4] : memref<1x256xf32, #tpu.memory_space<vmem>>, vector<1x256xf32>
    %c0_5 = arith.constant 0 : index
    %c0_6 = arith.constant 0 : index
    %3 = vector.load %arg0[%c0_5, %c0_6] : memref<32x16xf32, #tpu.memory_space<vmem>>, vector<32x16xf32>
    %cst = arith.constant dense<0.000000e+00> : vector<32x256xf32>
    %4 = tpu.matmul %3, %0, %cst {dimension_numbers = #tpu.dot_dimension_numbers<[1], [0], [0], [1], [0, 0, 1, 1], [], []>} : vector<32x16xf32>, vector<16x256xf32>, vector<32x256xf32> -> vector<32x256xf32>
    %5 = vector.broadcast %2 : vector<1x256xf32> to vector<32x256xf32>
    %6 = arith.addf %4, %5 : vector<32x256xf32>
    %cst_7 = arith.constant 0.000000e+00 : f32
    %7 = vector.broadcast %cst_7 : f32 to vector<4x64xf32>
    %cst_8 = arith.constant 0.000000e+00 : f32
    %8 = vector.broadcast %cst_8 : f32 to vector<4x32xf32>
    %cst_9 = arith.constant 0.000000e+00 : f32
    %9 = vector.broadcast %cst_9 : f32 to vector<4x32xf32>
    %10 = vector.extract_strided_slice %6 {offsets = [0, 0], sizes = [4, 128], strides = [1, 1]} : vector<32x256xf32> to vector<4x128xf32>
    %11 = vector.extract_strided_slice %6 {offsets = [28, 128], sizes = [4, 128], strides = [1, 1]} : vector<32x256xf32> to vector<4x128xf32>
    %12 = tpu.concatenate %10, %11 in 1 : vector<4x128xf32>, vector<4x128xf32> -> vector<4x256xf32>
    %cst_10 = arith.constant dense<0.000000e+00> : vector<4x256xf32>
    %13 = tpu.matmul %7, %1, %cst_10 {dimension_numbers = #tpu.dot_dimension_numbers<[1], [0], [0], [1], [0, 0, 1, 1], [], []>} : vector<4x64xf32>, vector<64x256xf32>, vector<4x256xf32> -> vector<4x256xf32>
    %14 = arith.addf %12, %13 : vector<4x256xf32>
    %15 = arith.negf %14 : vector<4x256xf32>
    %16 = math.exp %15 : vector<4x256xf32>
    %cst_11 = arith.constant 1.000000e+00 : f32
    %17 = vector.broadcast %cst_11 : f32 to vector<4x256xf32>
    %18 = arith.addf %17, %16 : vector<4x256xf32>
    %19 = arith.divf %17, %18 : vector<4x256xf32>
    %20 = vector.extract_strided_slice %19 {offsets = [0, 0], sizes = [4, 32], strides = [1, 1]} : vector<4x256xf32> to vector<4x32xf32>
    %21 = vector.extract_strided_slice %19 {offsets = [0, 32], sizes = [4, 32], strides = [1, 1]} : vector<4x256xf32> to vector<4x32xf32>
    %22 = vector.extract_strided_slice %19 {offsets = [0, 64], sizes = [4, 32], strides = [1, 1]} : vector<4x256xf32> to vector<4x32xf32>
    %23 = vector.extract_strided_slice %19 {offsets = [0, 96], sizes = [4, 32], strides = [1, 1]} : vector<4x256xf32> to vector<4x32xf32>
    %24 = vector.extract_strided_slice %19 {offsets = [0, 128], sizes = [4, 32], strides = [1, 1]} : vector<4x256xf32> to vector<4x32xf32>
    %25 = vector.extract_strided_slice %19 {offsets = [0, 160], sizes = [4, 32], strides = [1, 1]} : vector<4x256xf32> to vector<4x32xf32>
    %26 = vector.extract_strided_slice %19 {offsets = [0, 192], sizes = [4, 32], strides = [1, 1]} : vector<4x256xf32> to vector<4x32xf32>
    %27 = vector.extract_strided_slice %19 {offsets = [0, 224], sizes = [4, 32], strides = [1, 1]} : vector<4x256xf32> to vector<4x32xf32>
    %28 = arith.addf %21, %8 : vector<4x32xf32>
    %29 = arith.mulf %20, %22 : vector<4x32xf32>
    %30 = arith.addf %28, %29 : vector<4x32xf32>
    %31 = math.tanh %30 : vector<4x32xf32>
    %32 = arith.addf %23, %31 : vector<4x32xf32>
    %33 = arith.addf %25, %9 : vector<4x32xf32>
    %34 = arith.mulf %24, %26 : vector<4x32xf32>
    %35 = arith.addf %33, %34 : vector<4x32xf32>
    %36 = math.tanh %35 : vector<4x32xf32>
    %37 = arith.addf %27, %36 : vector<4x32xf32>
    %38 = tpu.concatenate %32, %37 in 1 : vector<4x32xf32>, vector<4x32xf32> -> vector<4x64xf32>
    %39 = vector.extract_strided_slice %6 {offsets = [4, 0], sizes = [4, 128], strides = [1, 1]} : vector<32x256xf32> to vector<4x128xf32>
    %40 = vector.extract_strided_slice %6 {offsets = [24, 128], sizes = [4, 128], strides = [1, 1]} : vector<32x256xf32> to vector<4x128xf32>
    %41 = tpu.concatenate %39, %40 in 1 : vector<4x128xf32>, vector<4x128xf32> -> vector<4x256xf32>
    %cst_12 = arith.constant dense<0.000000e+00> : vector<4x256xf32>
    %42 = tpu.matmul %38, %1, %cst_12 {dimension_numbers = #tpu.dot_dimension_numbers<[1], [0], [0], [1], [0, 0, 1, 1], [], []>} : vector<4x64xf32>, vector<64x256xf32>, vector<4x256xf32> -> vector<4x256xf32>
    %43 = arith.addf %41, %42 : vector<4x256xf32>
    %44 = arith.negf %43 : vector<4x256xf32>
    %45 = math.exp %44 : vector<4x256xf32>
    %cst_13 = arith.constant 1.000000e+00 : f32
    %46 = vector.broadcast %cst_13 : f32 to vector<4x256xf32>
    %47 = arith.addf %46, %45 : vector<4x256xf32>
    %48 = arith.divf %46, %47 : vector<4x256xf32>
    %49 = vector.extract_strided_slice %48 {offsets = [0, 0], sizes = [4, 32], strides = [1, 1]} : vector<4x256xf32> to vector<4x32xf32>
    %50 = vector.extract_strided_slice %48 {offsets = [0, 32], sizes = [4, 32], strides = [1, 1]} : vector<4x256xf32> to vector<4x32xf32>
    %51 = vector.extract_strided_slice %48 {offsets = [0, 64], sizes = [4, 32], strides = [1, 1]} : vector<4x256xf32> to vector<4x32xf32>
    %52 = vector.extract_strided_slice %48 {offsets = [0, 96], sizes = [4, 32], strides = [1, 1]} : vector<4x256xf32> to vector<4x32xf32>
    %53 = vector.extract_strided_slice %48 {offsets = [0, 128], sizes = [4, 32], strides = [1, 1]} : vector<4x256xf32> to vector<4x32xf32>
    %54 = vector.extract_strided_slice %48 {offsets = [0, 160], sizes = [4, 32], strides = [1, 1]} : vector<4x256xf32> to vector<4x32xf32>
    %55 = vector.extract_strided_slice %48 {offsets = [0, 192], sizes = [4, 32], strides = [1, 1]} : vector<4x256xf32> to vector<4x32xf32>
    %56 = vector.extract_strided_slice %48 {offsets = [0, 224], sizes = [4, 32], strides = [1, 1]} : vector<4x256xf32> to vector<4x32xf32>
    %57 = arith.addf %50, %30 : vector<4x32xf32>
    %58 = arith.mulf %49, %51 : vector<4x32xf32>
    %59 = arith.addf %57, %58 : vector<4x32xf32>
    %60 = math.tanh %59 : vector<4x32xf32>
    %61 = arith.addf %52, %60 : vector<4x32xf32>
    %62 = arith.addf %54, %35 : vector<4x32xf32>
    %63 = arith.mulf %53, %55 : vector<4x32xf32>
    %64 = arith.addf %62, %63 : vector<4x32xf32>
    %65 = math.tanh %64 : vector<4x32xf32>
    %66 = arith.addf %56, %65 : vector<4x32xf32>
    %67 = tpu.concatenate %61, %66 in 1 : vector<4x32xf32>, vector<4x32xf32> -> vector<4x64xf32>
    %68 = vector.extract_strided_slice %6 {offsets = [8, 0], sizes = [4, 128], strides = [1, 1]} : vector<32x256xf32> to vector<4x128xf32>
    %69 = vector.extract_strided_slice %6 {offsets = [20, 128], sizes = [4, 128], strides = [1, 1]} : vector<32x256xf32> to vector<4x128xf32>
    %70 = tpu.concatenate %68, %69 in 1 : vector<4x128xf32>, vector<4x128xf32> -> vector<4x256xf32>
    %cst_14 = arith.constant dense<0.000000e+00> : vector<4x256xf32>
    %71 = tpu.matmul %67, %1, %cst_14 {dimension_numbers = #tpu.dot_dimension_numbers<[1], [0], [0], [1], [0, 0, 1, 1], [], []>} : vector<4x64xf32>, vector<64x256xf32>, vector<4x256xf32> -> vector<4x256xf32>
    %72 = arith.addf %70, %71 : vector<4x256xf32>
    %73 = arith.negf %72 : vector<4x256xf32>
    %74 = math.exp %73 : vector<4x256xf32>
    %cst_15 = arith.constant 1.000000e+00 : f32
    %75 = vector.broadcast %cst_15 : f32 to vector<4x256xf32>
    %76 = arith.addf %75, %74 : vector<4x256xf32>
    %77 = arith.divf %75, %76 : vector<4x256xf32>
    %78 = vector.extract_strided_slice %77 {offsets = [0, 0], sizes = [4, 32], strides = [1, 1]} : vector<4x256xf32> to vector<4x32xf32>
    %79 = vector.extract_strided_slice %77 {offsets = [0, 32], sizes = [4, 32], strides = [1, 1]} : vector<4x256xf32> to vector<4x32xf32>
    %80 = vector.extract_strided_slice %77 {offsets = [0, 64], sizes = [4, 32], strides = [1, 1]} : vector<4x256xf32> to vector<4x32xf32>
    %81 = vector.extract_strided_slice %77 {offsets = [0, 96], sizes = [4, 32], strides = [1, 1]} : vector<4x256xf32> to vector<4x32xf32>
    %82 = vector.extract_strided_slice %77 {offsets = [0, 128], sizes = [4, 32], strides = [1, 1]} : vector<4x256xf32> to vector<4x32xf32>
    %83 = vector.extract_strided_slice %77 {offsets = [0, 160], sizes = [4, 32], strides = [1, 1]} : vector<4x256xf32> to vector<4x32xf32>
    %84 = vector.extract_strided_slice %77 {offsets = [0, 192], sizes = [4, 32], strides = [1, 1]} : vector<4x256xf32> to vector<4x32xf32>
    %85 = vector.extract_strided_slice %77 {offsets = [0, 224], sizes = [4, 32], strides = [1, 1]} : vector<4x256xf32> to vector<4x32xf32>
    %86 = arith.addf %79, %59 : vector<4x32xf32>
    %87 = arith.mulf %78, %80 : vector<4x32xf32>
    %88 = arith.addf %86, %87 : vector<4x32xf32>
    %89 = math.tanh %88 : vector<4x32xf32>
    %90 = arith.addf %81, %89 : vector<4x32xf32>
    %91 = arith.addf %83, %64 : vector<4x32xf32>
    %92 = arith.mulf %82, %84 : vector<4x32xf32>
    %93 = arith.addf %91, %92 : vector<4x32xf32>
    %94 = math.tanh %93 : vector<4x32xf32>
    %95 = arith.addf %85, %94 : vector<4x32xf32>
    %96 = tpu.concatenate %90, %95 in 1 : vector<4x32xf32>, vector<4x32xf32> -> vector<4x64xf32>
    %97 = vector.extract_strided_slice %6 {offsets = [12, 0], sizes = [4, 128], strides = [1, 1]} : vector<32x256xf32> to vector<4x128xf32>
    %98 = vector.extract_strided_slice %6 {offsets = [16, 128], sizes = [4, 128], strides = [1, 1]} : vector<32x256xf32> to vector<4x128xf32>
    %99 = tpu.concatenate %97, %98 in 1 : vector<4x128xf32>, vector<4x128xf32> -> vector<4x256xf32>
    %cst_16 = arith.constant dense<0.000000e+00> : vector<4x256xf32>
    %100 = tpu.matmul %96, %1, %cst_16 {dimension_numbers = #tpu.dot_dimension_numbers<[1], [0], [0], [1], [0, 0, 1, 1], [], []>} : vector<4x64xf32>, vector<64x256xf32>, vector<4x256xf32> -> vector<4x256xf32>
    %101 = arith.addf %99, %100 : vector<4x256xf32>
    %102 = arith.negf %101 : vector<4x256xf32>
    %103 = math.exp %102 : vector<4x256xf32>
    %cst_17 = arith.constant 1.000000e+00 : f32
    %104 = vector.broadcast %cst_17 : f32 to vector<4x256xf32>
    %105 = arith.addf %104, %103 : vector<4x256xf32>
    %106 = arith.divf %104, %105 : vector<4x256xf32>
    %107 = vector.extract_strided_slice %106 {offsets = [0, 0], sizes = [4, 32], strides = [1, 1]} : vector<4x256xf32> to vector<4x32xf32>
    %108 = vector.extract_strided_slice %106 {offsets = [0, 32], sizes = [4, 32], strides = [1, 1]} : vector<4x256xf32> to vector<4x32xf32>
    %109 = vector.extract_strided_slice %106 {offsets = [0, 64], sizes = [4, 32], strides = [1, 1]} : vector<4x256xf32> to vector<4x32xf32>
    %110 = vector.extract_strided_slice %106 {offsets = [0, 96], sizes = [4, 32], strides = [1, 1]} : vector<4x256xf32> to vector<4x32xf32>
    %111 = vector.extract_strided_slice %106 {offsets = [0, 128], sizes = [4, 32], strides = [1, 1]} : vector<4x256xf32> to vector<4x32xf32>
    %112 = vector.extract_strided_slice %106 {offsets = [0, 160], sizes = [4, 32], strides = [1, 1]} : vector<4x256xf32> to vector<4x32xf32>
    %113 = vector.extract_strided_slice %106 {offsets = [0, 192], sizes = [4, 32], strides = [1, 1]} : vector<4x256xf32> to vector<4x32xf32>
    %114 = vector.extract_strided_slice %106 {offsets = [0, 224], sizes = [4, 32], strides = [1, 1]} : vector<4x256xf32> to vector<4x32xf32>
    %115 = arith.addf %108, %88 : vector<4x32xf32>
    %116 = arith.mulf %107, %109 : vector<4x32xf32>
    %117 = arith.addf %115, %116 : vector<4x32xf32>
    %118 = math.tanh %117 : vector<4x32xf32>
    %119 = arith.addf %110, %118 : vector<4x32xf32>
    %120 = arith.addf %112, %93 : vector<4x32xf32>
    %121 = arith.mulf %111, %113 : vector<4x32xf32>
    %122 = arith.addf %120, %121 : vector<4x32xf32>
    %123 = math.tanh %122 : vector<4x32xf32>
    %124 = arith.addf %114, %123 : vector<4x32xf32>
    %125 = tpu.concatenate %119, %124 in 1 : vector<4x32xf32>, vector<4x32xf32> -> vector<4x64xf32>
    %126 = vector.extract_strided_slice %6 {offsets = [16, 0], sizes = [4, 128], strides = [1, 1]} : vector<32x256xf32> to vector<4x128xf32>
    %127 = vector.extract_strided_slice %6 {offsets = [12, 128], sizes = [4, 128], strides = [1, 1]} : vector<32x256xf32> to vector<4x128xf32>
    %128 = tpu.concatenate %126, %127 in 1 : vector<4x128xf32>, vector<4x128xf32> -> vector<4x256xf32>
    %cst_18 = arith.constant dense<0.000000e+00> : vector<4x256xf32>
    %129 = tpu.matmul %125, %1, %cst_18 {dimension_numbers = #tpu.dot_dimension_numbers<[1], [0], [0], [1], [0, 0, 1, 1], [], []>} : vector<4x64xf32>, vector<64x256xf32>, vector<4x256xf32> -> vector<4x256xf32>
    %130 = arith.addf %128, %129 : vector<4x256xf32>
    %131 = arith.negf %130 : vector<4x256xf32>
    %132 = math.exp %131 : vector<4x256xf32>
    %cst_19 = arith.constant 1.000000e+00 : f32
    %133 = vector.broadcast %cst_19 : f32 to vector<4x256xf32>
    %134 = arith.addf %133, %132 : vector<4x256xf32>
    %135 = arith.divf %133, %134 : vector<4x256xf32>
    %136 = vector.extract_strided_slice %135 {offsets = [0, 0], sizes = [4, 32], strides = [1, 1]} : vector<4x256xf32> to vector<4x32xf32>
    %137 = vector.extract_strided_slice %135 {offsets = [0, 32], sizes = [4, 32], strides = [1, 1]} : vector<4x256xf32> to vector<4x32xf32>
    %138 = vector.extract_strided_slice %135 {offsets = [0, 64], sizes = [4, 32], strides = [1, 1]} : vector<4x256xf32> to vector<4x32xf32>
    %139 = vector.extract_strided_slice %135 {offsets = [0, 96], sizes = [4, 32], strides = [1, 1]} : vector<4x256xf32> to vector<4x32xf32>
    %140 = vector.extract_strided_slice %135 {offsets = [0, 128], sizes = [4, 32], strides = [1, 1]} : vector<4x256xf32> to vector<4x32xf32>
    %141 = vector.extract_strided_slice %135 {offsets = [0, 160], sizes = [4, 32], strides = [1, 1]} : vector<4x256xf32> to vector<4x32xf32>
    %142 = vector.extract_strided_slice %135 {offsets = [0, 192], sizes = [4, 32], strides = [1, 1]} : vector<4x256xf32> to vector<4x32xf32>
    %143 = vector.extract_strided_slice %135 {offsets = [0, 224], sizes = [4, 32], strides = [1, 1]} : vector<4x256xf32> to vector<4x32xf32>
    %144 = arith.addf %137, %117 : vector<4x32xf32>
    %145 = arith.mulf %136, %138 : vector<4x32xf32>
    %146 = arith.addf %144, %145 : vector<4x32xf32>
    %147 = math.tanh %146 : vector<4x32xf32>
    %148 = arith.addf %139, %147 : vector<4x32xf32>
    %149 = arith.addf %141, %122 : vector<4x32xf32>
    %150 = arith.mulf %140, %142 : vector<4x32xf32>
    %151 = arith.addf %149, %150 : vector<4x32xf32>
    %152 = math.tanh %151 : vector<4x32xf32>
    %153 = arith.addf %143, %152 : vector<4x32xf32>
    %154 = tpu.concatenate %148, %153 in 1 : vector<4x32xf32>, vector<4x32xf32> -> vector<4x64xf32>
    %155 = vector.extract_strided_slice %6 {offsets = [20, 0], sizes = [4, 128], strides = [1, 1]} : vector<32x256xf32> to vector<4x128xf32>
    %156 = vector.extract_strided_slice %6 {offsets = [8, 128], sizes = [4, 128], strides = [1, 1]} : vector<32x256xf32> to vector<4x128xf32>
    %157 = tpu.concatenate %155, %156 in 1 : vector<4x128xf32>, vector<4x128xf32> -> vector<4x256xf32>
    %cst_20 = arith.constant dense<0.000000e+00> : vector<4x256xf32>
    %158 = tpu.matmul %154, %1, %cst_20 {dimension_numbers = #tpu.dot_dimension_numbers<[1], [0], [0], [1], [0, 0, 1, 1], [], []>} : vector<4x64xf32>, vector<64x256xf32>, vector<4x256xf32> -> vector<4x256xf32>
    %159 = arith.addf %157, %158 : vector<4x256xf32>
    %160 = arith.negf %159 : vector<4x256xf32>
    %161 = math.exp %160 : vector<4x256xf32>
    %cst_21 = arith.constant 1.000000e+00 : f32
    %162 = vector.broadcast %cst_21 : f32 to vector<4x256xf32>
    %163 = arith.addf %162, %161 : vector<4x256xf32>
    %164 = arith.divf %162, %163 : vector<4x256xf32>
    %165 = vector.extract_strided_slice %164 {offsets = [0, 0], sizes = [4, 32], strides = [1, 1]} : vector<4x256xf32> to vector<4x32xf32>
    %166 = vector.extract_strided_slice %164 {offsets = [0, 32], sizes = [4, 32], strides = [1, 1]} : vector<4x256xf32> to vector<4x32xf32>
    %167 = vector.extract_strided_slice %164 {offsets = [0, 64], sizes = [4, 32], strides = [1, 1]} : vector<4x256xf32> to vector<4x32xf32>
    %168 = vector.extract_strided_slice %164 {offsets = [0, 96], sizes = [4, 32], strides = [1, 1]} : vector<4x256xf32> to vector<4x32xf32>
    %169 = vector.extract_strided_slice %164 {offsets = [0, 128], sizes = [4, 32], strides = [1, 1]} : vector<4x256xf32> to vector<4x32xf32>
    %170 = vector.extract_strided_slice %164 {offsets = [0, 160], sizes = [4, 32], strides = [1, 1]} : vector<4x256xf32> to vector<4x32xf32>
    %171 = vector.extract_strided_slice %164 {offsets = [0, 192], sizes = [4, 32], strides = [1, 1]} : vector<4x256xf32> to vector<4x32xf32>
    %172 = vector.extract_strided_slice %164 {offsets = [0, 224], sizes = [4, 32], strides = [1, 1]} : vector<4x256xf32> to vector<4x32xf32>
    %173 = arith.addf %166, %146 : vector<4x32xf32>
    %174 = arith.mulf %165, %167 : vector<4x32xf32>
    %175 = arith.addf %173, %174 : vector<4x32xf32>
    %176 = math.tanh %175 : vector<4x32xf32>
    %177 = arith.addf %168, %176 : vector<4x32xf32>
    %178 = arith.addf %170, %151 : vector<4x32xf32>
    %179 = arith.mulf %169, %171 : vector<4x32xf32>
    %180 = arith.addf %178, %179 : vector<4x32xf32>
    %181 = math.tanh %180 : vector<4x32xf32>
    %182 = arith.addf %172, %181 : vector<4x32xf32>
    %183 = tpu.concatenate %177, %182 in 1 : vector<4x32xf32>, vector<4x32xf32> -> vector<4x64xf32>
    %184 = vector.extract_strided_slice %6 {offsets = [24, 0], sizes = [4, 128], strides = [1, 1]} : vector<32x256xf32> to vector<4x128xf32>
    %185 = vector.extract_strided_slice %6 {offsets = [4, 128], sizes = [4, 128], strides = [1, 1]} : vector<32x256xf32> to vector<4x128xf32>
    %186 = tpu.concatenate %184, %185 in 1 : vector<4x128xf32>, vector<4x128xf32> -> vector<4x256xf32>
    %cst_22 = arith.constant dense<0.000000e+00> : vector<4x256xf32>
    %187 = tpu.matmul %183, %1, %cst_22 {dimension_numbers = #tpu.dot_dimension_numbers<[1], [0], [0], [1], [0, 0, 1, 1], [], []>} : vector<4x64xf32>, vector<64x256xf32>, vector<4x256xf32> -> vector<4x256xf32>
    %188 = arith.addf %186, %187 : vector<4x256xf32>
    %189 = arith.negf %188 : vector<4x256xf32>
    %190 = math.exp %189 : vector<4x256xf32>
    %cst_23 = arith.constant 1.000000e+00 : f32
    %191 = vector.broadcast %cst_23 : f32 to vector<4x256xf32>
    %192 = arith.addf %191, %190 : vector<4x256xf32>
    %193 = arith.divf %191, %192 : vector<4x256xf32>
    %194 = vector.extract_strided_slice %193 {offsets = [0, 0], sizes = [4, 32], strides = [1, 1]} : vector<4x256xf32> to vector<4x32xf32>
    %195 = vector.extract_strided_slice %193 {offsets = [0, 32], sizes = [4, 32], strides = [1, 1]} : vector<4x256xf32> to vector<4x32xf32>
    %196 = vector.extract_strided_slice %193 {offsets = [0, 64], sizes = [4, 32], strides = [1, 1]} : vector<4x256xf32> to vector<4x32xf32>
    %197 = vector.extract_strided_slice %193 {offsets = [0, 96], sizes = [4, 32], strides = [1, 1]} : vector<4x256xf32> to vector<4x32xf32>
    %198 = vector.extract_strided_slice %193 {offsets = [0, 128], sizes = [4, 32], strides = [1, 1]} : vector<4x256xf32> to vector<4x32xf32>
    %199 = vector.extract_strided_slice %193 {offsets = [0, 160], sizes = [4, 32], strides = [1, 1]} : vector<4x256xf32> to vector<4x32xf32>
    %200 = vector.extract_strided_slice %193 {offsets = [0, 192], sizes = [4, 32], strides = [1, 1]} : vector<4x256xf32> to vector<4x32xf32>
    %201 = vector.extract_strided_slice %193 {offsets = [0, 224], sizes = [4, 32], strides = [1, 1]} : vector<4x256xf32> to vector<4x32xf32>
    %202 = arith.addf %195, %175 : vector<4x32xf32>
    %203 = arith.mulf %194, %196 : vector<4x32xf32>
    %204 = arith.addf %202, %203 : vector<4x32xf32>
    %205 = math.tanh %204 : vector<4x32xf32>
    %206 = arith.addf %197, %205 : vector<4x32xf32>
    %207 = arith.addf %199, %180 : vector<4x32xf32>
    %208 = arith.mulf %198, %200 : vector<4x32xf32>
    %209 = arith.addf %207, %208 : vector<4x32xf32>
    %210 = math.tanh %209 : vector<4x32xf32>
    %211 = arith.addf %201, %210 : vector<4x32xf32>
    %212 = tpu.concatenate %206, %211 in 1 : vector<4x32xf32>, vector<4x32xf32> -> vector<4x64xf32>
    %213 = vector.extract_strided_slice %6 {offsets = [28, 0], sizes = [4, 128], strides = [1, 1]} : vector<32x256xf32> to vector<4x128xf32>
    %214 = vector.extract_strided_slice %6 {offsets = [0, 128], sizes = [4, 128], strides = [1, 1]} : vector<32x256xf32> to vector<4x128xf32>
    %215 = tpu.concatenate %213, %214 in 1 : vector<4x128xf32>, vector<4x128xf32> -> vector<4x256xf32>
    %cst_24 = arith.constant dense<0.000000e+00> : vector<4x256xf32>
    %216 = tpu.matmul %212, %1, %cst_24 {dimension_numbers = #tpu.dot_dimension_numbers<[1], [0], [0], [1], [0, 0, 1, 1], [], []>} : vector<4x64xf32>, vector<64x256xf32>, vector<4x256xf32> -> vector<4x256xf32>
    %217 = arith.addf %215, %216 : vector<4x256xf32>
    %218 = arith.negf %217 : vector<4x256xf32>
    %219 = math.exp %218 : vector<4x256xf32>
    %cst_25 = arith.constant 1.000000e+00 : f32
    %220 = vector.broadcast %cst_25 : f32 to vector<4x256xf32>
    %221 = arith.addf %220, %219 : vector<4x256xf32>
    %222 = arith.divf %220, %221 : vector<4x256xf32>
    %223 = vector.extract_strided_slice %222 {offsets = [0, 0], sizes = [4, 32], strides = [1, 1]} : vector<4x256xf32> to vector<4x32xf32>
    %224 = vector.extract_strided_slice %222 {offsets = [0, 32], sizes = [4, 32], strides = [1, 1]} : vector<4x256xf32> to vector<4x32xf32>
    %225 = vector.extract_strided_slice %222 {offsets = [0, 64], sizes = [4, 32], strides = [1, 1]} : vector<4x256xf32> to vector<4x32xf32>
    %226 = vector.extract_strided_slice %222 {offsets = [0, 96], sizes = [4, 32], strides = [1, 1]} : vector<4x256xf32> to vector<4x32xf32>
    %227 = vector.extract_strided_slice %222 {offsets = [0, 128], sizes = [4, 32], strides = [1, 1]} : vector<4x256xf32> to vector<4x32xf32>
    %228 = vector.extract_strided_slice %222 {offsets = [0, 160], sizes = [4, 32], strides = [1, 1]} : vector<4x256xf32> to vector<4x32xf32>
    %229 = vector.extract_strided_slice %222 {offsets = [0, 192], sizes = [4, 32], strides = [1, 1]} : vector<4x256xf32> to vector<4x32xf32>
    %230 = vector.extract_strided_slice %222 {offsets = [0, 224], sizes = [4, 32], strides = [1, 1]} : vector<4x256xf32> to vector<4x32xf32>
    %231 = arith.addf %224, %204 : vector<4x32xf32>
    %232 = arith.mulf %223, %225 : vector<4x32xf32>
    %233 = arith.addf %231, %232 : vector<4x32xf32>
    %234 = math.tanh %233 : vector<4x32xf32>
    %235 = arith.addf %226, %234 : vector<4x32xf32>
    %236 = arith.addf %228, %209 : vector<4x32xf32>
    %237 = arith.mulf %227, %229 : vector<4x32xf32>
    %238 = arith.addf %236, %237 : vector<4x32xf32>
    %239 = math.tanh %238 : vector<4x32xf32>
    %240 = arith.addf %230, %239 : vector<4x32xf32>
    %241 = tpu.concatenate %235, %240 in 1 : vector<4x32xf32>, vector<4x32xf32> -> vector<4x64xf32>
    %c0_26 = arith.constant 0 : index
    %c0_27 = arith.constant 0 : index
    %c0_28 = arith.constant 0 : index
    %242 = vector.load %arg4[%c0_26, %c0_27, %c0_28] : memref<4x8x64xf32, #tpu.memory_space<vmem>>, vector<4x1x32xf32>
    %243 = vector.shape_cast %242 : vector<4x1x32xf32> to vector<4x32xf32>
    %244 = vector.shape_cast %32 : vector<4x32xf32> to vector<4x1x32xf32>
    tpu.vector_store %arg4[%c0_26, %c0_27, %c0_28], %244 {strides = array<i32>} : memref<4x8x64xf32, #tpu.memory_space<vmem>>, vector<4x1x32xf32>,
    %c0_29 = arith.constant 0 : index
    %c0_30 = arith.constant 0 : index
    %c32 = arith.constant 32 : index
    %245 = vector.load %arg4[%c0_29, %c0_30, %c32] : memref<4x8x64xf32, #tpu.memory_space<vmem>>, vector<4x1x32xf32>
    %246 = vector.shape_cast %245 : vector<4x1x32xf32> to vector<4x32xf32>
    %247 = vector.shape_cast %240 : vector<4x32xf32> to vector<4x1x32xf32>
    tpu.vector_store %arg4[%c0_29, %c0_30, %c32], %247 {strides = array<i32>} : memref<4x8x64xf32, #tpu.memory_space<vmem>>, vector<4x1x32xf32>,
    %c0_31 = arith.constant 0 : index
    %c1 = arith.constant 1 : index
    %c0_32 = arith.constant 0 : index
    %248 = vector.load %arg4[%c0_31, %c1, %c0_32] : memref<4x8x64xf32, #tpu.memory_space<vmem>>, vector<4x1x32xf32>
    %249 = vector.shape_cast %248 : vector<4x1x32xf32> to vector<4x32xf32>
    %250 = vector.shape_cast %61 : vector<4x32xf32> to vector<4x1x32xf32>
    tpu.vector_store %arg4[%c0_31, %c1, %c0_32], %250 {strides = array<i32>} : memref<4x8x64xf32, #tpu.memory_space<vmem>>, vector<4x1x32xf32>,
    %c0_33 = arith.constant 0 : index
    %c1_34 = arith.constant 1 : index
    %c32_35 = arith.constant 32 : index
    %251 = vector.load %arg4[%c0_33, %c1_34, %c32_35] : memref<4x8x64xf32, #tpu.memory_space<vmem>>, vector<4x1x32xf32>
    %252 = vector.shape_cast %251 : vector<4x1x32xf32> to vector<4x32xf32>
    %253 = vector.shape_cast %211 : vector<4x32xf32> to vector<4x1x32xf32>
    tpu.vector_store %arg4[%c0_33, %c1_34, %c32_35], %253 {strides = array<i32>} : memref<4x8x64xf32, #tpu.memory_space<vmem>>, vector<4x1x32xf32>,
    %c0_36 = arith.constant 0 : index
    %c2 = arith.constant 2 : index
    %c0_37 = arith.constant 0 : index
    %254 = vector.load %arg4[%c0_36, %c2, %c0_37] : memref<4x8x64xf32, #tpu.memory_space<vmem>>, vector<4x1x32xf32>
    %255 = vector.shape_cast %254 : vector<4x1x32xf32> to vector<4x32xf32>
    %256 = vector.shape_cast %90 : vector<4x32xf32> to vector<4x1x32xf32>
    tpu.vector_store %arg4[%c0_36, %c2, %c0_37], %256 {strides = array<i32>} : memref<4x8x64xf32, #tpu.memory_space<vmem>>, vector<4x1x32xf32>,
    %c0_38 = arith.constant 0 : index
    %c2_39 = arith.constant 2 : index
    %c32_40 = arith.constant 32 : index
    %257 = vector.load %arg4[%c0_38, %c2_39, %c32_40] : memref<4x8x64xf32, #tpu.memory_space<vmem>>, vector<4x1x32xf32>
    %258 = vector.shape_cast %257 : vector<4x1x32xf32> to vector<4x32xf32>
    %259 = vector.shape_cast %182 : vector<4x32xf32> to vector<4x1x32xf32>
    tpu.vector_store %arg4[%c0_38, %c2_39, %c32_40], %259 {strides = array<i32>} : memref<4x8x64xf32, #tpu.memory_space<vmem>>, vector<4x1x32xf32>,
    %c0_41 = arith.constant 0 : index
    %c3 = arith.constant 3 : index
    %c0_42 = arith.constant 0 : index
    %260 = vector.load %arg4[%c0_41, %c3, %c0_42] : memref<4x8x64xf32, #tpu.memory_space<vmem>>, vector<4x1x32xf32>
    %261 = vector.shape_cast %260 : vector<4x1x32xf32> to vector<4x32xf32>
    %262 = vector.shape_cast %119 : vector<4x32xf32> to vector<4x1x32xf32>
    tpu.vector_store %arg4[%c0_41, %c3, %c0_42], %262 {strides = array<i32>} : memref<4x8x64xf32, #tpu.memory_space<vmem>>, vector<4x1x32xf32>,
    %c0_43 = arith.constant 0 : index
    %c3_44 = arith.constant 3 : index
    %c32_45 = arith.constant 32 : index
    %263 = vector.load %arg4[%c0_43, %c3_44, %c32_45] : memref<4x8x64xf32, #tpu.memory_space<vmem>>, vector<4x1x32xf32>
    %264 = vector.shape_cast %263 : vector<4x1x32xf32> to vector<4x32xf32>
    %265 = vector.shape_cast %153 : vector<4x32xf32> to vector<4x1x32xf32>
    tpu.vector_store %arg4[%c0_43, %c3_44, %c32_45], %265 {strides = array<i32>} : memref<4x8x64xf32, #tpu.memory_space<vmem>>, vector<4x1x32xf32>,
    %c0_46 = arith.constant 0 : index
    %c4 = arith.constant 4 : index
    %c0_47 = arith.constant 0 : index
    %266 = vector.load %arg4[%c0_46, %c4, %c0_47] : memref<4x8x64xf32, #tpu.memory_space<vmem>>, vector<4x1x32xf32>
    %267 = vector.shape_cast %266 : vector<4x1x32xf32> to vector<4x32xf32>
    %268 = vector.shape_cast %148 : vector<4x32xf32> to vector<4x1x32xf32>
    tpu.vector_store %arg4[%c0_46, %c4, %c0_47], %268 {strides = array<i32>} : memref<4x8x64xf32, #tpu.memory_space<vmem>>, vector<4x1x32xf32>,
    %c0_48 = arith.constant 0 : index
    %c4_49 = arith.constant 4 : index
    %c32_50 = arith.constant 32 : index
    %269 = vector.load %arg4[%c0_48, %c4_49, %c32_50] : memref<4x8x64xf32, #tpu.memory_space<vmem>>, vector<4x1x32xf32>
    %270 = vector.shape_cast %269 : vector<4x1x32xf32> to vector<4x32xf32>
    %271 = vector.shape_cast %124 : vector<4x32xf32> to vector<4x1x32xf32>
    tpu.vector_store %arg4[%c0_48, %c4_49, %c32_50], %271 {strides = array<i32>} : memref<4x8x64xf32, #tpu.memory_space<vmem>>, vector<4x1x32xf32>,
    %c0_51 = arith.constant 0 : index
    %c5 = arith.constant 5 : index
    %c0_52 = arith.constant 0 : index
    %272 = vector.load %arg4[%c0_51, %c5, %c0_52] : memref<4x8x64xf32, #tpu.memory_space<vmem>>, vector<4x1x32xf32>
    %273 = vector.shape_cast %272 : vector<4x1x32xf32> to vector<4x32xf32>
    %274 = vector.shape_cast %177 : vector<4x32xf32> to vector<4x1x32xf32>
    tpu.vector_store %arg4[%c0_51, %c5, %c0_52], %274 {strides = array<i32>} : memref<4x8x64xf32, #tpu.memory_space<vmem>>, vector<4x1x32xf32>,
    %c0_53 = arith.constant 0 : index
    %c5_54 = arith.constant 5 : index
    %c32_55 = arith.constant 32 : index
    %275 = vector.load %arg4[%c0_53, %c5_54, %c32_55] : memref<4x8x64xf32, #tpu.memory_space<vmem>>, vector<4x1x32xf32>
    %276 = vector.shape_cast %275 : vector<4x1x32xf32> to vector<4x32xf32>
    %277 = vector.shape_cast %95 : vector<4x32xf32> to vector<4x1x32xf32>
    tpu.vector_store %arg4[%c0_53, %c5_54, %c32_55], %277 {strides = array<i32>} : memref<4x8x64xf32, #tpu.memory_space<vmem>>, vector<4x1x32xf32>,
    %c0_56 = arith.constant 0 : index
    %c6 = arith.constant 6 : index
    %c0_57 = arith.constant 0 : index
    %278 = vector.load %arg4[%c0_56, %c6, %c0_57] : memref<4x8x64xf32, #tpu.memory_space<vmem>>, vector<4x1x32xf32>
    %279 = vector.shape_cast %278 : vector<4x1x32xf32> to vector<4x32xf32>
    %280 = vector.shape_cast %206 : vector<4x32xf32> to vector<4x1x32xf32>
    tpu.vector_store %arg4[%c0_56, %c6, %c0_57], %280 {strides = array<i32>} : memref<4x8x64xf32, #tpu.memory_space<vmem>>, vector<4x1x32xf32>,
    %c0_58 = arith.constant 0 : index
    %c6_59 = arith.constant 6 : index
    %c32_60 = arith.constant 32 : index
    %281 = vector.load %arg4[%c0_58, %c6_59, %c32_60] : memref<4x8x64xf32, #tpu.memory_space<vmem>>, vector<4x1x32xf32>
    %282 = vector.shape_cast %281 : vector<4x1x32xf32> to vector<4x32xf32>
    %283 = vector.shape_cast %66 : vector<4x32xf32> to vector<4x1x32xf32>
    tpu.vector_store %arg4[%c0_58, %c6_59, %c32_60], %283 {strides = array<i32>} : memref<4x8x64xf32, #tpu.memory_space<vmem>>, vector<4x1x32xf32>,
    %c0_61 = arith.constant 0 : index
    %c7 = arith.constant 7 : index
    %c0_62 = arith.constant 0 : index
    %284 = vector.load %arg4[%c0_61, %c7, %c0_62] : memref<4x8x64xf32, #tpu.memory_space<vmem>>, vector<4x1x32xf32>
    %285 = vector.shape_cast %284 : vector<4x1x32xf32> to vector<4x32xf32>
    %286 = vector.shape_cast %235 : vector<4x32xf32> to vector<4x1x32xf32>
    tpu.vector_store %arg4[%c0_61, %c7, %c0_62], %286 {strides = array<i32>} : memref<4x8x64xf32, #tpu.memory_space<vmem>>, vector<4x1x32xf32>,
    %c0_63 = arith.constant 0 : index
    %c7_64 = arith.constant 7 : index
    %c32_65 = arith.constant 32 : index
    %287 = vector.load %arg4[%c0_63, %c7_64, %c32_65] : memref<4x8x64xf32, #tpu.memory_space<vmem>>, vector<4x1x32xf32>
    %288 = vector.shape_cast %287 : vector<4x1x32xf32> to vector<4x32xf32>
    %289 = vector.shape_cast %37 : vector<4x32xf32> to vector<4x1x32xf32>
    tpu.vector_store %arg4[%c0_63, %c7_64, %c32_65], %289 {strides = array<i32>} : memref<4x8x64xf32, #tpu.memory_space<vmem>>, vector<4x1x32xf32>,
    %c0_66 = arith.constant 0 : index
    %c0_67 = arith.constant 0 : index
    %290 = vector.load %arg5[%c0_66, %c0_67] : memref<4x64xf32, #tpu.memory_space<vmem>>, vector<4x64xf32>
    tpu.vector_store %arg5[%c0_66, %c0_67], %241 {strides = array<i32>} : memref<4x64xf32, #tpu.memory_space<vmem>>, vector<4x64xf32>,
    return
  }
}

</mosaic_0001>

<bundles_post_ra>
// kernel: bilstm_forward.1
= control target key start
LH: loop header
LB: loop body
LE: loop exit
PB: predicated region body
PF: predicated region fallthrough
CT: control target
= control target key end

     0   :  { %11 = vsyncpa [#allocation3], 0  ;;  %v2539_v7 = vmov 0.0   ;;  %vm57_vm0 = vcmask 130048   ;;  %s3222_s0 = inlined_call_operand.vmem [shape: f32[32,16], index: 0, kind: input, shape index: {}]   ;;  %s3223_s1 = inlined_call_operand.vmem [shape: f32[16,256], index: 1, kind: input, shape index: {}]   ;;  %s3224_s2 = inlined_call_operand.vmem [shape: f32[64,256], index: 2, kind: input, shape index: {}]   ;;  %s3225_s3 = inlined_call_operand.vmem [shape: f32[1,256], index: 3, kind: input, shape index: {}]   ;;  %s3226_s4 = inlined_call_operand.hbm [shape: f32[4,8,64], index: 4, kind: output, shape index: {0}]   ;;  %s3227_s5 = inlined_call_operand.hbm [shape: f32[4,64], index: 5, kind: output, shape index: {1}]  }
   0x1   :  { %v22_v0 = vld [vmem:[%s3223_s1 + $0x8] sm:$0xff]  ;;  %v24_v1 = vld [vmem:[%s3223_s1 + $0x18] sm:$0xff]  ;;  %v21_v5 = vld [vmem:[%s3223_s1] sm:$0xff]  ;;  %134 = vmatprep.mubr.f32.mxu0 %v2539_v7  ;;  %230 = vmatprep.mubr.f32.mxu1 %v2539_v7 }
   0x2   :  { %v26_v2 = vld [vmem:[%s3224_s2 + $0x8] sm:$0xff]  ;;  %v2255_v3 = vpack.c.bf16 %v24_v1, %v22_v0  ;;  %v28_v4 = vld [vmem:[%s3224_s2 + $0x18] sm:$0xff]  ;;  %v23_v6 = vld [vmem:[%s3223_s1 + $0x10] sm:$0xff] }
   0x3   :  { %v2597_v8 = vpack.c.bf16 %v28_v4, %v26_v2  ;;  %v2257_v9 = vpack.c.bf16 %v23_v6, %v21_v5  ;;  %v25_v10 = vld [vmem:[%s3224_s2] sm:$0xff]  ;;  %v27_v11 = vld [vmem:[%s3224_s2 + $0x10] sm:$0xff]  ;;  %v30_v13 = vld [vmem:[%s3224_s2 + $0x28] sm:$0xff] }
   0x4   :  { %2256 = vmatprep.subr.bf16.mxu0 %v2255_v3  ;;  %v2605_v12 = vpack.c.bf16 %v27_v11, %v25_v10  ;;  %v32_v14 = vld [vmem:[%s3224_s2 + $0x38] sm:$0xff]  ;;  %v29_v15 = vld [vmem:[%s3224_s2 + $0x20] sm:$0xff]  ;;  %v31_v18 = vld [vmem:[%s3224_s2 + $0x30] sm:$0xff] }
   0x5   :  { %2260 = vmatprep.subr.bf16.mxu1 %v2597_v8  ;;  %2258 = vmatpush1.bf16.msra.mxu0 %v2257_v9  ;;  %v42_v16 = vld [vmem:[%s3222_s0] sm:$0xff]  ;;  %v2620_v17 = vpack.c.bf16 %v32_v14, %v30_v13  ;;  %v34_v19 = vld [vmem:[%s3224_s2 + $0x48] sm:$0xff]  ;;  %v2629_v20 = vpack.c.bf16 %v31_v18, %v29_v15  ;;  %v36_v21 = vld [vmem:[%s3224_s2 + $0x58] sm:$0xff] }
   0x6   :  { %2262 = vmatpush1.bf16.msra.mxu1 %v2605_v12  ;;  %2276 = vmatprep.subr.bf16.mxu0 %v2597_v8  ;;  %v2636_v22 = vpack.c.bf16 %v36_v21, %v34_v19  ;;  %v33_v23 = vld [vmem:[%s3224_s2 + $0x40] sm:$0xff]  ;;  %v35_v24 = vld [vmem:[%s3224_s2 + $0x50] sm:$0xff]  ;;  %v38_v25 = vld [vmem:[%s3224_s2 + $0x68] sm:$0xff] }
   0x7   :  { %2264 = vmatprep.subr.bf16.mxu1 %v2620_v17  ;;  %v40_v26 = vld [vmem:[%s3224_s2 + $0x78] sm:$0xff]  ;;  %v43_v27 = vld [vmem:[%s3222_s0 + $0x8] sm:$0xff] }
   0x8   :  { %2228 = vmatmul.mubr.msk.f32.vlgmr.msra.gmra.mrb[0].mxu0 %vm57_vm0, %v42_v16 }
   0x9   :  { %140 = vmatprep.mubr.f32.mxu0 %v2539_v7  ;;  %2278 = vmatpush1.bf16.msra.mxu0 %v2605_v12 }
   0xa   :  { %12 = vsyncpa [#allocation5], 0  ;;  %2266 = vmatpush1.bf16.msra.mxu1 %v2629_v20  ;;  %v2657_v28 = vpack.c.bf16 %v35_v24, %v33_v23  ;;  %2280 = vmatprep.subr.bf16.mxu0 %v2620_v17  ;;  %v2661_v29 = vpack.c.bf16 %v40_v26, %v38_v25  ;;  %v37_v30 = vld [vmem:[%s3224_s2 + $0x60] sm:$0xff]  ;;  %v39_v31 = vld [vmem:[%s3224_s2 + $0x70] sm:$0xff]  ;;  %v47_v35 = vlaneseq  ;;  %s2541_s14 = smov 32   ;;  %vm293_vm1 = vcmask 261120  }
   0xb   :  { %2268 = vmatprep.subr.bf16.mxu1 %v2636_v22  ;;  %v44_v32 = vld [vmem:[%s3222_s0 + $0x10] sm:$0xff]  ;;  %v2676_v33 = vpack.c.bf16 %v39_v31, %v37_v30  ;;  %v45_v34 = vld [vmem:[%s3222_s0 + $0x18] sm:$0xff]  ;;  %v41_v38 = vld [vmem:[%s3225_s3] sm:$0x3]  ;;  %s2540_s3 = smov 64   ;;  %vm162_vm2 = vcmask 523264  }
   0xc   :  { %2229 = vmatmul.mubr.msk.f32.gmra.mrb[2].mxu0 %vm57_vm0, %v43_v27  ;;  %v2703_v36 = vshrl.u32 %v47_v35, 7  ;;  %vm1342_vm3 = vcmask 253952   ;;  %vm1400_vm4 = vcmask 516352   ;;  %s2543_s15 = smov [#allocation4]   ;;  %vm2196_vm5 = vcmask 523268  }
   0xd   :  { %146 = vmatprep.mubr.f32.mxu0 %v2539_v7  ;;  %2282 = vmatpush1.bf16.msra.mxu0 %v2629_v20  ;;  %s2216_s16 = sshll.u32 %s2543_s15, 4  ;;  %s2217_s16 = int_to_ptr.vmem [resolvable:$true] %s2216_s16 }
   0xe   :  { %2270 = vmatpush1.bf16.msra.mxu1 %v2657_v28  ;;  %2284 = vmatprep.subr.bf16.mxu0 %v2636_v22  ;;  %v53_v37 = vsub.s32 1, %v2703_v36  ;;  %v2710_v40 = vsub.s32 0, %v2703_v36  ;;  %s2491_s17 = scalar_lea.vmem %s2217_s16, 64  ;;  %p2496_p1 = scmp.lt.s32.totalorder %s2217_s16, %s2217_s16 }
   0xf   :  { %2272 = vmatprep.subr.bf16.mxu1 %v2661_v29  ;;  %p2492_p0 = scmp.ne.s32.totalorder %s2217_s16, %s2491_s17  ;;  %p2497_p2 = scmp.lt.s32.totalorder %s2491_s17, %s2491_s17 }
  0x10   :  { %2230 = vmatmul.mubr.msk.f32.gmra.mrb[4].mxu0 %vm57_vm0, %v44_v32  ;;  %v54_v39 = vrot.slane %v41_v38, %v53_v37  ;;  %v50_v44 = vrot.slane %v41_v38, %v2710_v40 }
  0x11   :  { %152 = vmatprep.mubr.f32.mxu0 %v2539_v7  ;;  %2286 = vmatpush1.bf16.msra.mxu0 %v2657_v28  ;;  %p2498_p3 = por %p2497_p2, %p2496_p1 }
  0x12   :  { %2274 = vmatpush1.bf16.msra.mxu1 %v2676_v33  ;;  %2288 = vmatprep.subr.bf16.mxu0 %v2661_v29 }
  0x13   :  { %2292 = vmatprep.subr.bf16.mxu1 %v2597_v8  ;;  %p2499_p4 = pnand %p2498_p3, %p2492_p0 }
  0x14   :  { %2231 = vmatmul.mubr.msk.f32.gmra.mrb[6].mxu0 %vm57_vm0, %v45_v34 }
  0x15   :  { %231 = vmatmul.mubr.f32.vlgmr.msra.gmra.mrb[0].mxu1 %v2539_v7  ;;  %2290 = vmatpush1.bf16.msra.mxu0 %v2676_v33 }
  0x16   :  { %362 = vmatprep.mubr.f32.mxu0 %v2539_v7  ;;  %2294 = vmatpush1.bf16.msra.mxu1 %v2605_v12 }
  0x17   :  { %2296 = vmatprep.subr.bf16.mxu1 %v2620_v17  ;;  %509 = vmatprep.mubr.f32.mxu1 %v2539_v7 }
  0x18   :  { %2308 = vmatprep.subr.bf16.mxu0 %v2597_v8 }
  0x1a   :  { %2298 = vmatpush1.bf16.msra.mxu1 %v2629_v20 }
  0x1b   :  { %2300 = vmatprep.subr.bf16.mxu1 %v2636_v22 }
  0x1e   :  { %2302 = vmatpush1.bf16.msra.mxu1 %v2657_v28 }
  0x1f   :  { %2304 = vmatprep.subr.bf16.mxu1 %v2661_v29 }
  0x22   :  { %2306 = vmatpush1.bf16.msra.mxu1 %v2676_v33 }
  0x23   :  { %2324 = vmatprep.subr.bf16.mxu1 %v2597_v8 }
  0xdb   :  { %v136_v41 = vpop.f32.mrb[0].mxu0 }
  0xdc   :  { %v138_v42 = vpop.f32.mrb[1].mxu0  ;;  %v2723_v53 = vadd.f32 %v136_v41, %v50_v44 }
  0xdd   :  { %v2712_v43 = vadd.f32 %v138_v42, %v54_v39 }
  0xdf   :  { %v142_v45 = vpop.f32.mrb[2].mxu0 }
  0xe0   :  { %v2715_v46 = vadd.f32 %v142_v45, %v50_v44  ;;  %v144_v47 = vpop.f32.mrb[3].mxu0 }
  0xe1   :  { %v2717_v48 = vadd.f32 %v144_v47, %v54_v39 }
  0xe3   :  { %v148_v49 = vpop.f32.mrb[4].mxu0 }
  0xe4   :  { %v2719_v50 = vadd.f32 %v148_v49, %v50_v44  ;;  %v150_v51 = vpop.f32.mrb[5].mxu0 }
  0xe5   :  { %v2721_v52 = vadd.f32 %v150_v51, %v54_v39 }
  0xe7   :  { %v154_v54 = vpop.f32.mrb[6].mxu0 }
  0xe8   :  { %v2725_v55 = vadd.f32 %v154_v54, %v50_v44  ;;  %v232_v56 = vpop.f32.mrb[0].mxu1  ;;  %v156_v57 = vpop.f32.mrb[7].mxu0 }
  0xe9   :  { %v237_v58 = vadd.f32 %v232_v56, %v2723_v53  ;;  %v2728_v59 = vadd.f32 %v156_v57, %v54_v39  ;;  %v234_v60 = vpop.f32.mrb[1].mxu1 }
  0xeb   :  { %v2232_v61 = vmul.f32 -1.442695, %v237_v58  ;;  %v160_v62 = vrot.slane %v2728_v59, 4 }
  0xed   :  { %2395 = vpow2.f32 %v2232_v61  ;;  %v238_v63 = vadd.f32 %v234_v60, %v160_v62 }
  0xef   :  { %v2233_v0 = vmul.f32 -1.442695, %v238_v63 }
  0xf1   :  { %2397 = vpow2.f32 %v2233_v0 }
  0xf7   :  { %v2396_v1 = vpop.eup %2395 }
  0xf8   :  { %v245_v2 = vadd.f32 1.0, %v2396_v1 }
  0xfa   :  { %2399 = vrcp.f32 %v245_v2 }
  0xfb   :  { %v2398_v3 = vpop.eup %2397 }
  0xfc   :  { %v246_v4 = vadd.f32 1.0, %v2398_v3 }
  0xfe   :  { %2401 = vrcp.f32 %v246_v4 }
 0x104   :  { %v2400_v5 = vpop.eup %2399 }
 0x105   :  { %253 = vrot.lane.b32.xlu0 %v2400_v5, %s2540_s3 }
 0x108   :  { %v2402_v6 = vpop.eup %2401 }
 0x109   :  { %270 = vrot.lane.b32.xlu0 %v2402_v6, %s2540_s3 }
 0x177   :  { %v254_v9 = vpop.permute.xlu0 %253 }
 0x178   :  { %v256_v10 = vmul.f32 %v2400_v5, %v254_v9 }
 0x17a   :  { %258 = vrot.lane.b32.xlu1 %v256_v10, %s2541_s14 }
 0x17b   :  { %v271_v11 = vpop.permute.xlu0 %270 }
 0x17c   :  { %v273_v13 = vmul.f32 %v2402_v6, %v271_v11 }
 0x17e   :  { %275 = vrot.lane.b32.xlu1 %v273_v13, %s2541_s14 }
 0x1ec   :  { %v259_v14 = vpop.permute.xlu1 %258 }
 0x1ed   :  { %v261_v15 = vadd.f32 %v2400_v5, %v259_v14 }
 0x1ef   :  { %2403 = vtanh.f32 %v261_v15  ;;  %v390_v59 = vrot.slane %v261_v15, 4 }
 0x1f0   :  { %v276_v16 = vpop.permute.xlu1 %275 }
 0x1f1   :  { %v278_v18 = vadd.f32 %v2402_v6, %v276_v16  ;;  %v439_v16 = vrot.slane %v2721_v52, 4 }
 0x1f3   :  { %2405 = vtanh.f32 %v278_v18  ;;  %v410_v60 = vrot.slane %v278_v18, 4 }
 0x1f9   :  { %v2404_v19 = vpop.eup %2403 }
 0x1fa   :  { %264 = vrot.lane.b32.xlu0 %v2404_v19, %s2540_s3 }
 0x1fd   :  { %v2406_v21 = vpop.eup %2405 }
 0x1fe   :  { %281 = vrot.lane.b32.xlu1 %v2406_v21, %s2540_s3 }
 0x26c   :  { %v265_v23 = vpop.permute.xlu0 %264 }
 0x26d   :  { %v2737_v24 = vadd.f32 %v2400_v5, %v265_v23 }
 0x26f   :  { %286 = vrot.lane.b32.xlu0 %v2737_v24, %s2541_s14 }
 0x270   :  { %v282_v25 = vpop.permute.xlu1 %281 }
 0x271   :  { %v2741_v26 = vadd.f32 %v2402_v6, %v282_v25 }
 0x273   :  { %290 = vrot.lane.b32.xlu1 %v2741_v26, %s2540_s3 }
 0x2e1   :  { %v287_v27 = vpop.permute.xlu0 %286 }
 0x2e5   :  { %v291_v30 = vpop.permute.xlu1 %290 }
 0x2e6   :  { %v294_v31 = vsel %vm293_vm1, %v287_v27, %v291_v30 }
 0x2e7   :  { %2234 = vmatmul.mubr.msk.f32.vlgmr.msra.gmra.mrb[8].mxu0 %vm162_vm2, %v294_v31 }
 0x2e8   :  { %2310 = vmatpush1.bf16.msra.mxu0 %v2605_v12  ;;  %646 = vmatprep.mubr.f32.mxu0 %v2539_v7 }
 0x2e9   :  { %2312 = vmatprep.subr.bf16.mxu0 %v2620_v17 }
 0x2ec   :  { %2314 = vmatpush1.bf16.msra.mxu0 %v2629_v20 }
 0x2ed   :  { %2316 = vmatprep.subr.bf16.mxu0 %v2636_v22 }
 0x2f0   :  { %2318 = vmatpush1.bf16.msra.mxu0 %v2657_v28 }
 0x2f1   :  { %2320 = vmatprep.subr.bf16.mxu0 %v2661_v29 }
 0x2f4   :  { %2322 = vmatpush1.bf16.msra.mxu0 %v2676_v33 }
 0x2f5   :  { %2340 = vmatprep.subr.bf16.mxu0 %v2597_v8 }
 0x3ba   :  { %v364_v32 = vpop.f32.mrb[8].mxu0 }
 0x3bb   :  { %v371_v34 = vrot.slane %v364_v32, 4  ;;  %v366_v35 = vpop.f32.mrb[9].mxu0 }
 0x3bc   :  { %v372_v37 = vrot.slane %v366_v35, 4 }
 0x3bd   :  { %v375_v38 = vadd.f32 %v371_v34, %v2723_v53 }
 0x3be   :  { %v376_v39 = vadd.f32 %v372_v37, %v160_v62 }
 0x3bf   :  { %v2235_v41 = vmul.f32 -1.442695, %v375_v38 }
 0x3c0   :  { %v2236_v42 = vmul.f32 -1.442695, %v376_v39 }
 0x3c1   :  { %2407 = vpow2.f32 %v2235_v41 }
 0x3c2   :  { %2409 = vpow2.f32 %v2236_v42 }
 0x3cb   :  { %v2408_v44 = vpop.eup %2407 }
 0x3cc   :  { %v2410_v45 = vpop.eup %2409  ;;  %v383_v47 = vadd.f32 1.0, %v2408_v44 }
 0x3cd   :  { %v384_v49 = vadd.f32 1.0, %v2410_v45 }
 0x3ce   :  { %2411 = vrcp.f32 %v383_v47 }
 0x3cf   :  { %2413 = vrcp.f32 %v384_v49 }
 0x3d8   :  { %v2412_v51 = vpop.eup %2411 }
 0x3d9   :  { %v2414_v54 = vpop.eup %2413  ;;  %394 = vrot.lane.b32.xlu0 %v2412_v51, %s2540_s3  ;;  %v392_v61 = vadd.f32 %v2412_v51, %v390_v59 }
 0x3da   :  { %414 = vrot.lane.b32.xlu1 %v2414_v54, %s2540_s3  ;;  %v412_v63 = vadd.f32 %v2414_v54, %v410_v60 }
 0x44b   :  { %v395_v56 = vpop.permute.xlu0 %394 }
 0x44c   :  { %v397_v57 = vmul.f32 %v2412_v51, %v395_v56  ;;  %v415_v53 = vpop.permute.xlu1 %414 }
 0x44d   :  { %v417_v58 = vmul.f32 %v2414_v54, %v415_v53 }
 0x44e   :  { %399 = vrot.lane.b32.xlu0 %v397_v57, %s2541_s14 }
 0x44f   :  { %419 = vrot.lane.b32.xlu1 %v417_v58, %s2541_s14 }
 0x4c0   :  { %v400_v62 = vpop.permute.xlu0 %399 }
 0x4c1   :  { %v402_v0 = vadd.f32 %v400_v62, %v392_v61  ;;  %v420_v1 = vpop.permute.xlu1 %419 }
 0x4c2   :  { %v422_v2 = vadd.f32 %v420_v1, %v412_v63 }
 0x4c3   :  { %2415 = vtanh.f32 %v402_v0  ;;  %v531_v44 = vrot.slane %v402_v0, 4 }
 0x4c4   :  { %2417 = vtanh.f32 %v422_v2  ;;  %v551_v45 = vrot.slane %v422_v2, 4 }
 0x4cd   :  { %v2416_v3 = vpop.eup %2415 }
 0x4ce   :  { %v2418_v4 = vpop.eup %2417  ;;  %405 = vrot.lane.b32.xlu0 %v2416_v3, %s2540_s3 }
 0x4cf   :  { %425 = vrot.lane.b32.xlu1 %v2418_v4, %s2540_s3 }
 0x540   :  { %v406_v5 = vpop.permute.xlu0 %405 }
 0x541   :  { %v2763_v6 = vadd.f32 %v2412_v51, %v406_v5  ;;  %v426_v9 = vpop.permute.xlu1 %425 }
 0x542   :  { %v2765_v10 = vadd.f32 %v2414_v54, %v426_v9 }
 0x543   :  { %430 = vrot.lane.b32.xlu0 %v2763_v6, %s2541_s14 }
 0x544   :  { %434 = vrot.lane.b32.xlu1 %v2765_v10, %s2540_s3 }
 0x5b5   :  { %v431_v11 = vpop.permute.xlu0 %430 }
 0x5b6   :  { %v435_v13 = vpop.permute.xlu1 %434 }
 0x5b7   :  { %v437_v14 = vsel %vm293_vm1, %v431_v11, %v435_v13 }
 0x5b8   :  { %v442_v15 = vrot.slane %v437_v14, 4 }
 0x5ba   :  { %2237 = vmatmul.mubr.msk.f32.vlgmr.msra.gmra.mrb[2].mxu1 %vm162_vm2, %v442_v15 }
 0x5bb   :  { %2326 = vmatpush1.bf16.msra.mxu1 %v2605_v12  ;;  %793 = vmatprep.mubr.f32.mxu1 %v2539_v7 }
 0x5bc   :  { %2328 = vmatprep.subr.bf16.mxu1 %v2620_v17 }
 0x5bf   :  { %2330 = vmatpush1.bf16.msra.mxu1 %v2629_v20 }
 0x5c0   :  { %2332 = vmatprep.subr.bf16.mxu1 %v2636_v22 }
 0x5c3   :  { %2334 = vmatpush1.bf16.msra.mxu1 %v2657_v28 }
 0x5c4   :  { %2336 = vmatprep.subr.bf16.mxu1 %v2661_v29 }
 0x5c7   :  { %2338 = vmatpush1.bf16.msra.mxu1 %v2676_v33 }
 0x5c8   :  { %2356 = vmatprep.subr.bf16.mxu1 %v2597_v8 }
 0x68d   :  { %v511_v18 = vpop.f32.mrb[2].mxu1 }
 0x68e   :  { %v516_v19 = vadd.f32 %v511_v18, %v2715_v46  ;;  %v513_v21 = vpop.f32.mrb[3].mxu1 }
 0x68f   :  { %v517_v23 = vadd.f32 %v513_v21, %v439_v16 }
 0x690   :  { %v2238_v25 = vmul.f32 -1.442695, %v516_v19 }
 0x691   :  { %v2239_v27 = vmul.f32 -1.442695, %v517_v23 }
 0x692   :  { %2419 = vpow2.f32 %v2238_v25 }
 0x693   :  { %2421 = vpow2.f32 %v2239_v27 }
 0x69c   :  { %v2420_v30 = vpop.eup %2419 }
 0x69d   :  { %v2422_v31 = vpop.eup %2421  ;;  %v524_v32 = vadd.f32 1.0, %v2420_v30 }
 0x69e   :  { %v525_v34 = vadd.f32 1.0, %v2422_v31 }
 0x69f   :  { %2423 = vrcp.f32 %v524_v32 }
 0x6a0   :  { %2425 = vrcp.f32 %v525_v34 }
 0x6a9   :  { %v2424_v35 = vpop.eup %2423 }
 0x6aa   :  { %v2426_v37 = vpop.eup %2425  ;;  %535 = vrot.lane.b32.xlu0 %v2424_v35, %s2540_s3  ;;  %v533_v47 = vadd.f32 %v2424_v35, %v531_v44 }
 0x6ab   :  { %555 = vrot.lane.b32.xlu1 %v2426_v37, %s2540_s3  ;;  %v553_v51 = vadd.f32 %v2426_v37, %v551_v45 }
 0x71c   :  { %v536_v38 = vpop.permute.xlu0 %535 }
 0x71d   :  { %v538_v39 = vmul.f32 %v2424_v35, %v536_v38  ;;  %v556_v41 = vpop.permute.xlu1 %555 }
 0x71e   :  { %v558_v42 = vmul.f32 %v2426_v37, %v556_v41 }
 0x71f   :  { %540 = vrot.lane.b32.xlu0 %v538_v39, %s2541_s14 }
 0x720   :  { %560 = vrot.lane.b32.xlu1 %v558_v42, %s2541_s14 }
 0x791   :  { %v541_v49 = vpop.permute.xlu0 %540 }
 0x792   :  { %v543_v54 = vadd.f32 %v541_v49, %v533_v47  ;;  %v561_v56 = vpop.permute.xlu1 %560 }
 0x793   :  { %v563_v57 = vadd.f32 %v561_v56, %v553_v51 }
 0x794   :  { %2427 = vtanh.f32 %v543_v54  ;;  %v674_v27 = vrot.slane %v543_v54, 4 }
 0x795   :  { %2429 = vtanh.f32 %v563_v57  ;;  %v694_v30 = vrot.slane %v563_v57, 4  ;;  %v723_v57 = vrot.slane %v2717_v48, 4 }
 0x79e   :  { %v2428_v53 = vpop.eup %2427 }
 0x79f   :  { %v2430_v58 = vpop.eup %2429  ;;  %546 = vrot.lane.b32.xlu0 %v2428_v53, %s2540_s3 }
 0x7a0   :  { %566 = vrot.lane.b32.xlu1 %v2430_v58, %s2540_s3 }
 0x811   :  { %v547_v59 = vpop.permute.xlu0 %546 }
 0x812   :  { %v2792_v60 = vadd.f32 %v2424_v35, %v547_v59  ;;  %v567_v61 = vpop.permute.xlu1 %566 }
 0x813   :  { %v2794_v62 = vadd.f32 %v2426_v37, %v567_v61 }
 0x814   :  { %571 = vrot.lane.b32.xlu0 %v2792_v60, %s2541_s14 }
 0x815   :  { %575 = vrot.lane.b32.xlu1 %v2794_v62, %s2540_s3 }
 0x886   :  { %v572_v63 = vpop.permute.xlu0 %571 }
 0x887   :  { %v576_v0 = vpop.permute.xlu1 %575 }
 0x888   :  { %v578_v1 = vsel %vm293_vm1, %v572_v63, %v576_v0 }
 0x889   :  { %2240 = vmatmul.mubr.msk.f32.vlgmr.msra.gmra.mrb[10].mxu0 %vm162_vm2, %v578_v1 }
 0x88a   :  { %2342 = vmatpush1.bf16.msra.mxu0 %v2605_v12  ;;  %930 = vmatprep.mubr.f32.mxu0 %v2539_v7 }
 0x88b   :  { %2344 = vmatprep.subr.bf16.mxu0 %v2620_v17 }
 0x88e   :  { %2346 = vmatpush1.bf16.msra.mxu0 %v2629_v20 }
 0x88f   :  { %2348 = vmatprep.subr.bf16.mxu0 %v2636_v22 }
 0x892   :  { %2350 = vmatpush1.bf16.msra.mxu0 %v2657_v28 }
 0x893   :  { %2352 = vmatprep.subr.bf16.mxu0 %v2661_v29 }
 0x896   :  { %2354 = vmatpush1.bf16.msra.mxu0 %v2676_v33 }
 0x897   :  { %2372 = vmatprep.subr.bf16.mxu0 %v2597_v8 }
 0x95c   :  { %v648_v2 = vpop.f32.mrb[10].mxu0 }
 0x95d   :  { %v655_v3 = vrot.slane %v648_v2, 4  ;;  %v650_v4 = vpop.f32.mrb[11].mxu0 }
 0x95e   :  { %v656_v5 = vrot.slane %v650_v4, 4 }
 0x95f   :  { %v659_v9 = vadd.f32 %v655_v3, %v2715_v46 }
 0x960   :  { %v660_v11 = vadd.f32 %v656_v5, %v439_v16 }
 0x961   :  { %v2241_v13 = vmul.f32 -1.442695, %v659_v9 }
 0x962   :  { %v2242_v14 = vmul.f32 -1.442695, %v660_v11 }
 0x963   :  { %2431 = vpow2.f32 %v2241_v13 }
 0x964   :  { %2433 = vpow2.f32 %v2242_v14 }
 0x96d   :  { %v2432_v15 = vpop.eup %2431 }
 0x96e   :  { %v2434_v18 = vpop.eup %2433  ;;  %v667_v19 = vadd.f32 1.0, %v2432_v15 }
 0x96f   :  { %v668_v21 = vadd.f32 1.0, %v2434_v18 }
 0x970   :  { %2435 = vrcp.f32 %v667_v19 }
 0x971   :  { %2437 = vrcp.f32 %v668_v21 }
 0x97a   :  { %v2436_v8 = vpop.eup %2435 }
 0x97b   :  { %v2438_v23 = vpop.eup %2437  ;;  %678 = vrot.lane.b32.xlu0 %v2436_v8, %s2540_s3  ;;  %v676_v31 = vadd.f32 %v2436_v8, %v674_v27 }
 0x97c   :  { %698 = vrot.lane.b32.xlu1 %v2438_v23, %s2540_s3  ;;  %v696_v34 = vadd.f32 %v2438_v23, %v694_v30 }
 0x9ed   :  { %v679_v46 = vpop.permute.xlu0 %678 }
 0x9ee   :  { %v681_v25 = vmul.f32 %v2436_v8, %v679_v46  ;;  %v699_v52 = vpop.permute.xlu1 %698 }
 0x9ef   :  { %v701_v16 = vmul.f32 %v2438_v23, %v699_v52 }
 0x9f0   :  { %683 = vrot.lane.b32.xlu0 %v681_v25, %s2541_s14 }
 0x9f1   :  { %703 = vrot.lane.b32.xlu1 %v701_v16, %s2541_s14 }
 0xa62   :  { %v684_v32 = vpop.permute.xlu0 %683 }
 0xa63   :  { %v686_v35 = vadd.f32 %v684_v32, %v676_v31  ;;  %v704_v37 = vpop.permute.xlu1 %703 }
 0xa64   :  { %v706_v38 = vadd.f32 %v704_v37, %v696_v34 }
 0xa65   :  { %2439 = vtanh.f32 %v686_v35  ;;  %v815_v15 = vrot.slane %v686_v35, 4 }
 0xa66   :  { %2441 = vtanh.f32 %v706_v38  ;;  %v835_v18 = vrot.slane %v706_v38, 4 }
 0xa6f   :  { %v2440_v39 = vpop.eup %2439 }
 0xa70   :  { %v2442_v41 = vpop.eup %2441  ;;  %689 = vrot.lane.b32.xlu0 %v2440_v39, %s2540_s3 }
 0xa71   :  { %709 = vrot.lane.b32.xlu1 %v2442_v41, %s2540_s3 }
 0xae2   :  { %v690_v42 = vpop.permute.xlu0 %689 }
 0xae3   :  { %v2820_v44 = vadd.f32 %v2436_v8, %v690_v42  ;;  %v710_v45 = vpop.permute.xlu1 %709 }
 0xae4   :  { %v2822_v47 = vadd.f32 %v2438_v23, %v710_v45 }
 0xae5   :  { %714 = vrot.lane.b32.xlu0 %v2820_v44, %s2541_s14 }
 0xae6   :  { %718 = vrot.lane.b32.xlu1 %v2822_v47, %s2540_s3 }
 0xb57   :  { %v715_v49 = vpop.permute.xlu0 %714 }
 0xb58   :  { %v719_v51 = vpop.permute.xlu1 %718 }
 0xb59   :  { %v721_v54 = vsel %vm293_vm1, %v715_v49, %v719_v51 }
 0xb5a   :  { %v726_v56 = vrot.slane %v721_v54, 4 }
 0xb5c   :  { %2243 = vmatmul.mubr.msk.f32.vlgmr.msra.gmra.mrb[4].mxu1 %vm162_vm2, %v726_v56 }
 0xb5d   :  { %2358 = vmatpush1.bf16.msra.mxu1 %v2605_v12  ;;  %1077 = vmatprep.mubr.f32.mxu1 %v2539_v7 }
 0xb5e   :  { %2360 = vmatprep.subr.bf16.mxu1 %v2620_v17 }
 0xb61   :  { %2362 = vmatpush1.bf16.msra.mxu1 %v2629_v20 }
 0xb62   :  { %2364 = vmatprep.subr.bf16.mxu1 %v2636_v22 }
 0xb65   :  { %2366 = vmatpush1.bf16.msra.mxu1 %v2657_v28 }
 0xb66   :  { %2368 = vmatprep.subr.bf16.mxu1 %v2661_v29 }
 0xb69   :  { %2370 = vmatpush1.bf16.msra.mxu1 %v2676_v33 }
 0xc2f   :  { %v795_v53 = vpop.f32.mrb[4].mxu1 }
 0xc30   :  { %v800_v58 = vadd.f32 %v795_v53, %v2719_v50  ;;  %v797_v59 = vpop.f32.mrb[5].mxu1 }
 0xc31   :  { %v801_v61 = vadd.f32 %v797_v59, %v723_v57 }
 0xc32   :  { %v2244_v63 = vmul.f32 -1.442695, %v800_v58 }
 0xc33   :  { %v2245_v0 = vmul.f32 -1.442695, %v801_v61 }
 0xc34   :  { %2443 = vpow2.f32 %v2244_v63 }
 0xc35   :  { %2445 = vpow2.f32 %v2245_v0 }
 0xc3e   :  { %v2444_v1 = vpop.eup %2443 }
 0xc3f   :  { %v2446_v2 = vpop.eup %2445  ;;  %v808_v3 = vadd.f32 1.0, %v2444_v1 }
 0xc40   :  { %v809_v4 = vadd.f32 1.0, %v2446_v2 }
 0xc41   :  { %2447 = vrcp.f32 %v808_v3 }
 0xc42   :  { %2449 = vrcp.f32 %v809_v4 }
 0xc4b   :  { %v2448_v5 = vpop.eup %2447 }
 0xc4c   :  { %v2450_v9 = vpop.eup %2449  ;;  %819 = vrot.lane.b32.xlu0 %v2448_v5, %s2540_s3  ;;  %v817_v19 = vadd.f32 %v2448_v5, %v815_v15 }
 0xc4d   :  { %839 = vrot.lane.b32.xlu1 %v2450_v9, %s2540_s3  ;;  %v837_v8 = vadd.f32 %v2450_v9, %v835_v18  ;;  %v1007_v18 = vrot.slane %v2712_v43, 4 }
 0xcbe   :  { %v820_v48 = vpop.permute.xlu0 %819 }
 0xcbf   :  { %v822_v11 = vmul.f32 %v2448_v5, %v820_v48  ;;  %v840_v13 = vpop.permute.xlu1 %839 }
 0xcc0   :  { %v842_v14 = vmul.f32 %v2450_v9, %v840_v13 }
 0xcc1   :  { %824 = vrot.lane.b32.xlu0 %v822_v11, %s2541_s14 }
 0xcc2   :  { %844 = vrot.lane.b32.xlu1 %v842_v14, %s2541_s14 }
 0xd33   :  { %v825_v21 = vpop.permute.xlu0 %824 }
 0xd34   :  { %v827_v23 = vadd.f32 %v825_v21, %v817_v19  ;;  %v845_v46 = vpop.permute.xlu1 %844 }
 0xd35   :  { %v847_v25 = vadd.f32 %v845_v46, %v837_v8 }
 0xd36   :  { %2451 = vtanh.f32 %v827_v23 }
 0xd37   :  { %2453 = vtanh.f32 %v847_v25  ;;  %v978_v53 = vrot.slane %v847_v25, 4 }
 0xd40   :  { %v2452_v52 = vpop.eup %2451 }
 0xd41   :  { %v2454_v16 = vpop.eup %2453  ;;  %830 = vrot.lane.b32.xlu0 %v2452_v52, %s2540_s3 }
 0xd42   :  { %850 = vrot.lane.b32.xlu1 %v2454_v16, %s2540_s3 }
 0xdb3   :  { %v831_v27 = vpop.permute.xlu0 %830 }
 0xdb4   :  { %v2846_v30 = vadd.f32 %v2448_v5, %v831_v27  ;;  %v851_v31 = vpop.permute.xlu1 %850 }
 0xdb5   :  { %v2848_v32 = vadd.f32 %v2450_v9, %v851_v31 }
 0xdb6   :  { %855 = vrot.lane.b32.xlu0 %v2846_v30, %s2541_s14 }
 0xdb7   :  { %859 = vrot.lane.b32.xlu1 %v2848_v32, %s2540_s3 }
 0xe28   :  { %v856_v34 = vpop.permute.xlu0 %855 }
 0xe29   :  { %v860_v35 = vpop.permute.xlu1 %859 }
 0xe2a   :  { %v862_v37 = vsel %vm293_vm1, %v856_v34, %v860_v35 }
 0xe2b   :  { %2246 = vmatmul.mubr.msk.f32.vlgmr.msra.gmra.mrb[12].mxu0 %vm162_vm2, %v862_v37 }
 0xe2c   :  { %2374 = vmatpush1.bf16.msra.mxu0 %v2605_v12  ;;  %1214 = vmatprep.mubr.f32.mxu0 %v2539_v7 }
 0xe2d   :  { %2376 = vmatprep.subr.bf16.mxu0 %v2620_v17 }
 0xe30   :  { %2378 = vmatpush1.bf16.msra.mxu0 %v2629_v20 }
 0xe31   :  { %2380 = vmatprep.subr.bf16.mxu0 %v2636_v22 }
 0xe34   :  { %2382 = vmatpush1.bf16.msra.mxu0 %v2657_v28 }
 0xe35   :  { %2384 = vmatprep.subr.bf16.mxu0 %v2661_v29 }
 0xe38   :  { %2386 = vmatpush1.bf16.msra.mxu0 %v2676_v33 }
 0xefe   :  { %v932_v38 = vpop.f32.mrb[12].mxu0 }
 0xeff   :  { %v939_v39 = vrot.slane %v932_v38, 4  ;;  %v934_v41 = vpop.f32.mrb[13].mxu0 }
 0xf00   :  { %v940_v42 = vrot.slane %v934_v41, 4 }
 0xf01   :  { %v943_v12 = vadd.f32 %v939_v39, %v2719_v50 }
 0xf02   :  { %v944_v45 = vadd.f32 %v940_v42, %v723_v57  ;;  %v958_v57 = vrot.slane %v827_v23, 4 }
 0xf03   :  { %v2247_v7 = vmul.f32 -1.442695, %v943_v12 }
 0xf04   :  { %v2248_v49 = vmul.f32 -1.442695, %v944_v45 }
 0xf05   :  { %2455 = vpow2.f32 %v2247_v7 }
 0xf06   :  { %2457 = vpow2.f32 %v2248_v49 }
 0xf0f   :  { %v2456_v17 = vpop.eup %2455 }
 0xf10   :  { %v2458_v20 = vpop.eup %2457  ;;  %v951_v22 = vadd.f32 1.0, %v2456_v17 }
 0xf11   :  { %v952_v51 = vadd.f32 1.0, %v2458_v20 }
 0xf12   :  { %2459 = vrcp.f32 %v951_v22 }
 0xf13   :  { %2461 = vrcp.f32 %v952_v51 }
 0xf1c   :  { %v2460_v28 = vpop.eup %2459 }
 0xf1d   :  { %v2462_v29 = vpop.eup %2461  ;;  %962 = vrot.lane.b32.xlu0 %v2460_v28, %s2540_s3  ;;  %v960_v58 = vadd.f32 %v2460_v28, %v958_v57 }
 0xf1e   :  { %982 = vrot.lane.b32.xlu1 %v2462_v29, %s2540_s3  ;;  %v980_v61 = vadd.f32 %v2462_v29, %v978_v53 }
 0xf8f   :  { %v963_v33 = vpop.permute.xlu0 %962 }
 0xf90   :  { %v965_v54 = vmul.f32 %v2460_v28, %v963_v33  ;;  %v983_v50 = vpop.permute.xlu1 %982 }
 0xf91   :  { %v985_v56 = vmul.f32 %v2462_v29, %v983_v50 }
 0xf92   :  { %967 = vrot.lane.b32.xlu0 %v965_v54, %s2541_s14 }
 0xf93   :  { %987 = vrot.lane.b32.xlu1 %v985_v56, %s2541_s14 }
0x1004   :  { %v968_v59 = vpop.permute.xlu0 %967 }
0x1005   :  { %v970_v63 = vadd.f32 %v968_v59, %v960_v58  ;;  %v988_v0 = vpop.permute.xlu1 %987 }
0x1006   :  { %v990_v1 = vadd.f32 %v988_v0, %v980_v61 }
0x1007   :  { %2463 = vtanh.f32 %v970_v63  ;;  %v1099_v41 = vrot.slane %v970_v63, 4 }
0x1008   :  { %2465 = vtanh.f32 %v990_v1  ;;  %v1119_v42 = vrot.slane %v990_v1, 4 }
0x1011   :  { %v2464_v2 = vpop.eup %2463 }
0x1012   :  { %v2466_v3 = vpop.eup %2465  ;;  %973 = vrot.lane.b32.xlu0 %v2464_v2, %s2540_s3 }
0x1013   :  { %993 = vrot.lane.b32.xlu1 %v2466_v3, %s2540_s3 }
0x1084   :  { %v974_v4 = vpop.permute.xlu0 %973 }
0x1085   :  { %v2871_v5 = vadd.f32 %v2460_v28, %v974_v4  ;;  %v994_v9 = vpop.permute.xlu1 %993 }
0x1086   :  { %v2873_v48 = vadd.f32 %v2462_v29, %v994_v9 }
0x1087   :  { %998 = vrot.lane.b32.xlu0 %v2871_v5, %s2541_s14 }
0x1088   :  { %1002 = vrot.lane.b32.xlu1 %v2873_v48, %s2540_s3 }
0x10f9   :  { %v999_v11 = vpop.permute.xlu0 %998 }
0x10fa   :  { %v1003_v13 = vpop.permute.xlu1 %1002 }
0x10fb   :  { %v1005_v14 = vsel %vm293_vm1, %v999_v11, %v1003_v13 }
0x10fc   :  { %v1010_v15 = vrot.slane %v1005_v14, 4 }
0x10fe   :  { %2249 = vmatmul.mubr.msk.f32.vlgmr.msra.gmra.mrb[6].mxu1 %vm162_vm2, %v1010_v15 }
0x11d1   :  { %v1079_v19 = vpop.f32.mrb[6].mxu1 }
0x11d2   :  { %v1084_v21 = vadd.f32 %v1079_v19, %v2725_v55  ;;  %v1081_v8 = vpop.f32.mrb[7].mxu1 }
0x11d3   :  { %v1085_v23 = vadd.f32 %v1081_v8, %v1007_v18 }
0x11d4   :  { %v2250_v46 = vmul.f32 -1.442695, %v1084_v21 }
0x11d5   :  { %v2251_v25 = vmul.f32 -1.442695, %v1085_v23  ;;  %v1405_v23 = vcombine.high %v2763_v6, %v2763_v6 }
0x11d6   :  { %2467 = vpow2.f32 %v2250_v46 }
0x11d7   :  { %2469 = vpow2.f32 %v2251_v25 }
0x11e0   :  { %v2468_v52 = vpop.eup %2467 }
0x11e1   :  { %v2470_v16 = vpop.eup %2469  ;;  %v1092_v27 = vadd.f32 1.0, %v2468_v52 }
0x11e2   :  { %v1093_v31 = vadd.f32 1.0, %v2470_v16 }
0x11e3   :  { %2471 = vrcp.f32 %v1092_v27 }
0x11e4   :  { %2473 = vrcp.f32 %v1093_v31 }
0x11ed   :  { %v2472_v34 = vpop.eup %2471 }
0x11ee   :  { %v2474_v35 = vpop.eup %2473  ;;  %1103 = vrot.lane.b32.xlu0 %v2472_v34, %s2540_s3  ;;  %v1101_v12 = vadd.f32 %v2472_v34, %v1099_v41 }
0x11ef   :  { %1123 = vrot.lane.b32.xlu1 %v2474_v35, %s2540_s3  ;;  %v1121_v7 = vadd.f32 %v2474_v35, %v1119_v42 }
0x1260   :  { %v1104_v43 = vpop.permute.xlu0 %1103 }
0x1261   :  { %v1106_v37 = vmul.f32 %v2472_v34, %v1104_v43  ;;  %v1124_v38 = vpop.permute.xlu1 %1123 }
0x1262   :  { %v1126_v39 = vmul.f32 %v2474_v35, %v1124_v38 }
0x1263   :  { %1108 = vrot.lane.b32.xlu0 %v1106_v37, %s2541_s14 }
0x1264   :  { %1128 = vrot.lane.b32.xlu1 %v1126_v39, %s2541_s14 }
0x12d5   :  { %v1109_v45 = vpop.permute.xlu0 %1108 }
0x12d6   :  { %v2887_v49 = vadd.f32 %v1109_v45, %v1101_v12  ;;  %v1129_v17 = vpop.permute.xlu1 %1128 }
0x12d7   :  { %v2889_v20 = vadd.f32 %v1129_v17, %v1121_v7 }
0x12d8   :  { %2475 = vtanh.f32 %v2887_v49 }
0x12d9   :  { %2477 = vtanh.f32 %v2889_v20 }
0x12e2   :  { %v2476_v22 = vpop.eup %2475 }
0x12e3   :  { %v2478_v51 = vpop.eup %2477  ;;  %1114 = vrot.lane.b32.xlu0 %v2476_v22, %s2540_s3 }
0x12e4   :  { %1134 = vrot.lane.b32.xlu1 %v2478_v51, %s2540_s3 }
0x1355   :  { %v1115_v28 = vpop.permute.xlu0 %1114 }
0x1356   :  { %v2895_v29 = vadd.f32 %v2472_v34, %v1115_v28  ;;  %v1135_v33 = vpop.permute.xlu1 %1134 }
0x1357   :  { %v1137_v54 = vadd.f32 %v2474_v35, %v1135_v33 }
0x1358   :  { %1139 = vrot.lane.b32.xlu0 %v2895_v29, %s2541_s14 }
0x1359   :  { %1143 = vrot.lane.b32.xlu1 %v1137_v54, %s2540_s3 }
0x13ca   :  { %v1140_v50 = vpop.permute.xlu0 %1139 }
0x13cb   :  { %v1144_v56 = vpop.permute.xlu1 %1143 }
0x13cc   :  { %v1146_v57 = vsel %vm293_vm1, %v1140_v50, %v1144_v56 }
0x13cd   :  { %2252 = vmatmul.mubr.msk.f32.vlgmr.msra.gmra.mrb[14].mxu0 %vm162_vm2, %v1146_v57 }
0x14a0   :  { %v1216_v53 = vpop.f32.mrb[14].mxu0 }
0x14a1   :  { %v1223_v58 = vrot.slane %v1216_v53, 4  ;;  %v1218_v59 = vpop.f32.mrb[15].mxu0 }
0x14a2   :  { %v1224_v61 = vrot.slane %v1218_v59, 4 }
0x14a3   :  { %v1227_v63 = vadd.f32 %v1223_v58, %v2725_v55  ;;  %v2542_v55 = vmov 1966171168   ;;  %v1574_v58 = vcombine.high %v2873_v48, %v2873_v48 }
0x14a4   :  { %v1228_v0 = vadd.f32 %v1224_v61, %v1007_v18  ;;  %v1291_v15 = vunpack.c.l.s4 %v2542_v55 }
0x14a5   :  { %v2253_v1 = vmul.f32 -1.442695, %v1227_v63 }
0x14a6   :  { %v2254_v2 = vmul.f32 -1.442695, %v1228_v0  ;;  %v1292_v18 = vunpack.c.0.s8 %v1291_v15 }
0x14a7   :  { %2479 = vpow2.f32 %v2253_v1 }
0x14a8   :  { %2481 = vpow2.f32 %v2254_v2  ;;  %v2912_v19 = vsub.s32 %v1292_v18, %v2703_v36 }
0x14aa   :  { %v1296_v21 = vrot.slane %v2737_v24, %v2912_v19  ;;  %v1412_v27 = vrot.slane %v1405_v23, %v2912_v19  ;;  %v1468_v39 = vrot.slane %v1137_v54, %v2912_v19  ;;  %v1524_v33 = vrot.slane %v2792_v60, %v2912_v19 }
0x14ab   :  { %v1581_v0 = vrot.slane %v1574_v58, %v2912_v19 }
0x14ac   :  { %v1297_v8 = vcombine.high %v1296_v21, %v1296_v21  ;;  %v1304_v25 = vrot.slane %v1296_v21, %v2912_v19  ;;  %v1413_v6 = vcombine.high %v1412_v27, %v1412_v27  ;;  %v1420_v38 = vrot.slane %v1412_v27, %v2912_v19 }
0x14ad   :  { %v1469_v7 = vcombine.high %v1468_v39, %v1468_v39  ;;  %v1476_v51 = vrot.slane %v1468_v39, %v2912_v19  ;;  %v1525_v53 = vcombine.high %v1524_v33, %v1524_v33  ;;  %v1532_v60 = vrot.slane %v1524_v33, %v2912_v19 }
0x14ae   :  { %v1311_v36 = vrot.slane %v1297_v8, %v2912_v19  ;;  %v1317_v24 = vrot.slane %v1304_v25, %v2710_v40  ;;  %v1312_v34 = vcombine.high %v1304_v25, %v1304_v25  ;;  %v1427_v42 = vrot.slane %v1413_v6, %v2912_v19 }
0x14af   :  { %v1433_v12 = vrot.slane %v1420_v38, %v2710_v40  ;;  %v1428_v45 = vcombine.high %v1420_v38, %v1420_v38  ;;  %v1483_v50 = vrot.slane %v1469_v7, %v2912_v19  ;;  %v1489_v56 = vrot.slane %v1476_v51, %v2710_v40 }
0x14b0   :  { %v1321_v35 = vrot.slane %v1311_v36, %v2710_v40  ;;  %v1313_v43 = vcombine.high %v1311_v36, %v1311_v36  ;;  %v1325_v37 = vrot.slane %v1312_v34, %v2710_v40  ;;  %v1437_v17 = vrot.slane %v1427_v42, %v2710_v40 }
0x14b1   :  { %v2480_v3 = vpop.eup %2479  ;;  %v1429_v22 = vcombine.high %v1427_v42, %v1427_v42  ;;  %v1441_v28 = vrot.slane %v1428_v45, %v2710_v40  ;;  %v1484_v57 = vcombine.high %v1476_v51, %v1476_v51  ;;  %v1493_v59 = vrot.slane %v1483_v50, %v2710_v40 }
0x14b2   :  { %v2482_v4 = vpop.eup %2481  ;;  %v1235_v9 = vadd.f32 1.0, %v2480_v3  ;;  %v1329_v41 = vrot.slane %v1313_v43, %v2710_v40  ;;  %v1485_v61 = vcombine.high %v1483_v50, %v1483_v50  ;;  %v1539_v2 = vrot.slane %v1525_v53, %v2912_v19 }
0x14b3   :  { %v1236_v11 = vadd.f32 1.0, %v2482_v4  ;;  %v1445_v54 = vrot.slane %v1429_v22, %v2710_v40  ;;  %v1497_v63 = vrot.slane %v1484_v57, %v2710_v40  ;;  %v1545_v48 = vrot.slane %v1532_v60, %v2710_v40 }
0x14b4   :  { %2483 = vrcp.f32 %v1235_v9  ;;  %v1501_v1 = vrot.slane %v1485_v61, %v2710_v40  ;;  %v1540_v3 = vcombine.high %v1532_v60, %v1532_v60  ;;  %v1631_v4 = vcombine.high %v2820_v44, %v2820_v44 }
0x14b5   :  { %2485 = vrcp.f32 %v1236_v11  ;;  %v1582_v9 = vcombine.high %v1581_v0, %v1581_v0  ;;  %v1549_v11 = vrot.slane %v1539_v2, %v2710_v40  ;;  %v1541_v55 = vcombine.high %v1539_v2, %v1539_v2 }
0x14b6   :  { %v1553_v15 = vrot.slane %v1540_v3, %v2710_v40  ;;  %v1589_v18 = vrot.slane %v1581_v0, %v2912_v19  ;;  %v1638_v21 = vrot.slane %v1631_v4, %v2912_v19  ;;  %v1694_v36 = vrot.slane %v2848_v32, %v2912_v19 }
0x14b7   :  { %v1557_v8 = vrot.slane %v1541_v55, %v2710_v40  ;;  %v1596_v23 = vrot.slane %v1582_v9, %v2912_v19  ;;  %v1242_v50 = vrot.slane %v2887_v49, 4  ;;  %v1857_v0 = vcombine.high %v2871_v5, %v2871_v5 }
0x14b8   :  { %v1602_v44 = vrot.slane %v1589_v18, %v2710_v40  ;;  %v1639_v25 = vcombine.high %v1638_v21, %v1638_v21  ;;  %v1695_v43 = vcombine.high %v1694_v36, %v1694_v36  ;;  %v1702_v32 = vrot.slane %v1694_v36, %v2912_v19 }
0x14ba   :  { %v1653_v34 = vrot.slane %v1639_v25, %v2912_v19  ;;  %v1715_v45 = vrot.slane %v1702_v32, %v2710_v40  ;;  %v1710_v7 = vcombine.high %v1702_v32, %v1702_v32 }
0x14bc   :  { %v1655_v38 = vcombine.high %v1653_v34, %v1653_v34 }
0x14be   :  { %v2903_v13 = vpop.eup %2483  ;;  %v1671_v42 = vrot.slane %v1655_v38, %v2710_v40 }
0x14bf   :  { %v2905_v14 = vpop.eup %2485  ;;  %1246 = vrot.lane.b32.xlu0 %v2903_v13, %s2540_s3  ;;  %v1244_v57 = vadd.f32 %v2903_v13, %v1242_v50 }
0x14c0   :  { %1266 = vrot.lane.b32.xlu1 %v2905_v14, %s2540_s3 }
0x1531   :  { %v1247_v46 = vpop.permute.xlu0 %1246 }
0x1532   :  { %v1249_v52 = vmul.f32 %v2903_v13, %v1247_v46  ;;  %v1267_v16 = vpop.permute.xlu1 %1266  ;;  %v1597_v46 = vcombine.high %v1589_v18, %v1589_v18 }
0x1533   :  { %v1269_v31 = vmul.f32 %v2905_v14, %v1267_v16  ;;  %v1598_v16 = vcombine.high %v1596_v23, %v1596_v23 }
0x1534   :  { %1251 = vrot.lane.b32.xlu0 %v1249_v52, %s2541_s14  ;;  %v1606_v52 = vrot.slane %v1596_v23, %v2710_v40  ;;  %v1610_v27 = vrot.slane %v1597_v46, %v2710_v40 }
0x1535   :  { %1271 = vrot.lane.b32.xlu1 %v1269_v31, %s2541_s14  ;;  %v1646_v31 = vrot.slane %v1638_v21, %v2912_v19 }
0x1537   :  { %v1659_v6 = vrot.slane %v1646_v31, %v2710_v40 }
0x1538   :  { %1330 = vrot.lane.b32.xlu0 %v1317_v24, %s2541_s14  ;;  %v1614_v24 = vrot.slane %v1598_v16, %v2710_v40 }
0x1539   :  { %1332 = vrot.lane.b32.xlu1 %v1321_v35, %s2541_s14  ;;  %v1654_v35 = vcombine.high %v1646_v31, %v1646_v31 }
0x153b   :  { %v1667_v39 = vrot.slane %v1654_v35, %v2710_v40 }
0x153c   :  { %1334 = vrot.lane.b32.xlu0 %v1325_v37, %s2541_s14  ;;  %v1663_v37 = vrot.slane %v1653_v34, %v2710_v40 }
0x153d   :  { %1336 = vrot.lane.b32.xlu1 %v1329_v41, %s2541_s14  ;;  %v1750_v41 = vrot.slane %v2846_v30, %v2912_v19  ;;  %v1723_v30 = vrot.slane %v1710_v7, %v2710_v40 }
0x1540   :  { %1446 = vrot.lane.b32.xlu0 %v1433_v12, %s2541_s14  ;;  %v1709_v12 = vrot.slane %v1695_v43, %v2912_v19 }
0x1541   :  { %1448 = vrot.lane.b32.xlu1 %v1437_v17, %s2541_s14  ;;  %v1751_v17 = vcombine.high %v1750_v41, %v1750_v41 }
0x1542   :  { %v1719_v22 = vrot.slane %v1709_v12, %v2710_v40  ;;  %v1711_v51 = vcombine.high %v1709_v12, %v1709_v12 }
0x1543   :  { %v1765_v33 = vrot.slane %v1751_v17, %v2912_v19 }
0x1544   :  { %1450 = vrot.lane.b32.xlu0 %v1441_v28, %s2541_s14  ;;  %v1727_v28 = vrot.slane %v1711_v51, %v2710_v40 }
0x1545   :  { %1452 = vrot.lane.b32.xlu1 %v1445_v54, %s2541_s14  ;;  %v1775_v54 = vrot.slane %v1765_v33, %v2710_v40 }
0x1548   :  { %1502 = vrot.lane.b32.xlu0 %v1489_v56, %s2540_s3  ;;  %v1262_v56 = vrot.slane %v2889_v20, 4 }
0x1549   :  { %1504 = vrot.lane.b32.xlu1 %v1493_v59, %s2540_s3 }
0x154a   :  { %v1264_v58 = vadd.f32 %v2905_v14, %v1262_v56 }
0x154c   :  { %1506 = vrot.lane.b32.xlu0 %v1497_v63, %s2540_s3 }
0x154d   :  { %1508 = vrot.lane.b32.xlu1 %v1501_v1, %s2540_s3  ;;  %v1864_v1 = vrot.slane %v1857_v0, %v2912_v19 }
0x154f   :  { %v1865_v9 = vcombine.high %v1864_v1, %v1864_v1  ;;  %v1872_v16 = vrot.slane %v1864_v1, %v2912_v19 }
0x1550   :  { %1558 = vrot.lane.b32.xlu0 %v1545_v48, %s2541_s14  ;;  %v1758_v48 = vrot.slane %v1750_v41, %v2912_v19 }
0x1551   :  { %1560 = vrot.lane.b32.xlu1 %v1549_v11, %s2541_s14  ;;  %v1767_v11 = vcombine.high %v1765_v33, %v1765_v33  ;;  %v1879_v46 = vrot.slane %v1865_v9, %v2912_v19  ;;  %v1880_v35 = vcombine.high %v1872_v16, %v1872_v16 }
0x1552   :  { %v1771_v18 = vrot.slane %v1758_v48, %v2710_v40  ;;  %v1766_v21 = vcombine.high %v1758_v48, %v1758_v48 }
0x1553   :  { %v1889_v36 = vrot.slane %v1879_v46, %v2710_v40  ;;  %v1893_v41 = vrot.slane %v1880_v35, %v2710_v40 }
0x1554   :  { %1562 = vrot.lane.b32.xlu0 %v1553_v15, %s2541_s14 }
0x1555   :  { %1564 = vrot.lane.b32.xlu1 %v1557_v8, %s2541_s14  ;;  %v1976_v8 = vrot.slane %v2895_v29, %v2912_v19  ;;  %v1800_v29 = vcombine.high %v2822_v47, %v2822_v47 }
0x1557   :  { %v1807_v43 = vrot.slane %v1800_v29, %v2912_v19  ;;  %v1984_v32 = vrot.slane %v1976_v8, %v2912_v19 }
0x1558   :  { %1615 = vrot.lane.b32.xlu0 %v1602_v44, %s2540_s3  ;;  %v1783_v44 = vrot.slane %v1767_v11, %v2710_v40 }
0x1559   :  { %1617 = vrot.lane.b32.xlu1 %v1606_v52, %s2540_s3  ;;  %v1779_v52 = vrot.slane %v1766_v21, %v2710_v40  ;;  %v1992_v17 = vcombine.high %v1984_v32, %v1984_v32  ;;  %v1815_v50 = vrot.slane %v1807_v43, %v2912_v19  ;;  %v2146_v21 = vrot.slane %v2741_v26, %v2912_v19 }
0x155b   :  { %v1823_v0 = vcombine.high %v1815_v50, %v1815_v50 }
0x155c   :  { %1619 = vrot.lane.b32.xlu0 %v1610_v27, %s2540_s3  ;;  %v1977_v27 = vcombine.high %v1976_v8, %v1976_v8 }
0x155d   :  { %1621 = vrot.lane.b32.xlu1 %v1614_v24, %s2540_s3  ;;  %v1881_v24 = vcombine.high %v1879_v46, %v1879_v46 }
0x155e   :  { %v1991_v47 = vrot.slane %v1977_v27, %v2912_v19 }
0x155f   :  { %v1897_v38 = vrot.slane %v1881_v24, %v2710_v40 }
0x1560   :  { %1672 = vrot.lane.b32.xlu0 %v1659_v6, %s2541_s14  ;;  %v1885_v6 = vrot.slane %v1872_v16, %v2710_v40  ;;  %v1993_v12 = vcombine.high %v1991_v47, %v1991_v47  ;;  %v2001_v7 = vrot.slane %v1991_v47, %v2710_v40  ;;  %v2147_v16 = vcombine.high %v2146_v21, %v2146_v21 }
0x1561   :  { %1674 = vrot.lane.b32.xlu1 %v1663_v37, %s2541_s14 }
0x1562   :  { %v2009_v33 = vrot.slane %v1993_v12, %v2710_v40 }
0x1564   :  { %1676 = vrot.lane.b32.xlu0 %v1667_v39, %s2541_s14 }
0x1565   :  { %1678 = vrot.lane.b32.xlu1 %v1671_v42, %s2541_s14  ;;  %v1808_v42 = vcombine.high %v1807_v43, %v1807_v43  ;;  %v3117_v43 = vrot.slane %v2146_v21, %v2912_v19 }
0x1568   :  { %1728 = vrot.lane.b32.xlu0 %v1715_v45, %s2540_s3 }
0x1569   :  { %1730 = vrot.lane.b32.xlu1 %v1719_v22, %s2540_s3  ;;  %v1997_v22 = vrot.slane %v1984_v32, %v2710_v40  ;;  %v2167_v32 = vrot.slane %v3117_v43, %v2710_v40 }
0x156c   :  { %1732 = vrot.lane.b32.xlu0 %v1723_v30, %s2540_s3  ;;  %v1920_v30 = vrot.slane %v2794_v62, %v2912_v19  ;;  %v2026_v62 = vcombine.high %v2765_v10, %v2765_v10 }
0x156d   :  { %1734 = vrot.lane.b32.xlu1 %v1727_v28, %s2540_s3 }
0x1571   :  { %1786 = vrot.lane.b32.xlu1 %v1775_v54, %s2541_s14  ;;  %v1822_v54 = vrot.slane %v1808_v42, %v2912_v19 }
0x15a6   :  { %v1252_v53 = vpop.permute.xlu0 %1251 }
0x15a7   :  { %v1254_v59 = vadd.f32 %v1252_v53, %v1244_v57  ;;  %v1272_v61 = vpop.permute.xlu1 %1271  ;;  %v2005_v57 = vrot.slane %v1992_v17, %v2710_v40  ;;  %v1921_v53 = vcombine.high %v1920_v30, %v1920_v30 }
0x15a8   :  { %v1274_v60 = vadd.f32 %v1272_v61, %v1264_v58  ;;  %v1824_v61 = vcombine.high %v1822_v54, %v1822_v54 }
0x15a9   :  { %2487 = vtanh.f32 %v1254_v59  ;;  %v1832_v59 = vrot.slane %v1822_v54, %v2710_v40  ;;  %v1935_v10 = vrot.slane %v1921_v53, %v2912_v19 }
0x15aa   :  { %2489 = vtanh.f32 %v1274_v60  ;;  %v1331_v63 = vpop.permute.xlu0 %1330  ;;  %v1840_v1 = vrot.slane %v1824_v61, %v2710_v40 }
0x15ab   :  { %1343 = vst.msk [vmem:[#allocation2] sm:$0x1] %vm1342_vm3, %v1331_v63  ;;  %v1333_v49 = vpop.permute.xlu1 %1332  ;;  %v1828_v63 = vrot.slane %v1815_v50, %v2710_v40  ;;  %v1937_v11 = vcombine.high %v1935_v10, %v1935_v10 }
0x15ac   :  { %1344 = vst.msk [vmem:[#allocation2 + $0x8] sm:$0x1] %vm1342_vm3, %v1333_v49  ;;  %v2033_v49 = vrot.slane %v2026_v62, %v2912_v19 }
0x15ae   :  { %v1335_v20 = vpop.permute.xlu0 %1334  ;;  %v2041_v46 = vrot.slane %v2033_v49, %v2912_v19 }
0x15af   :  { %1345 = vst.msk [vmem:[#allocation2 + $0x10] sm:$0x1] %vm1342_vm3, %v1335_v20  ;;  %v1337_v2 = vpop.permute.xlu1 %1336 }
0x15b0   :  { %1346 = vst.msk [vmem:[#allocation2 + $0x18] sm:$0x1] %vm1342_vm3, %v1337_v2  ;;  %v1928_v2 = vrot.slane %v1920_v30, %v2912_v19  ;;  %v2049_v24 = vcombine.high %v2041_v46, %v2041_v46 }
0x15b2   :  { %v1447_v3 = vpop.permute.xlu0 %1446  ;;  %v2062_v47 = vrot.slane %v2049_v24, %v2710_v40 }
0x15b3   :  { %v2488_v4 = vpop.eup %2487  ;;  %1458 = vst.msk [vmem:[#allocation2 + $0x1] sm:$0x1] %vm1342_vm3, %v1447_v3  ;;  %v1449_v5 = vpop.permute.xlu1 %1448  ;;  %v1836_v3 = vrot.slane %v1823_v0, %v2710_v40 }
0x15b4   :  { %v2490_v55 = vpop.eup %2489  ;;  %1459 = vst.msk [vmem:[#allocation2 + $0x9] sm:$0x1] %vm1342_vm3, %v1449_v5  ;;  %1257 = vrot.lane.b32.xlu0 %v2488_v4, %s2540_s3  ;;  %v2034_v4 = vcombine.high %v2033_v49, %v2033_v49  ;;  %v1945_v5 = vrot.slane %v1935_v10, %v2710_v40 }
0x15b5   :  { %1277 = vrot.lane.b32.xlu1 %v2490_v55, %s2540_s3  ;;  %v1936_v55 = vcombine.high %v1928_v2, %v1928_v2 }
0x15b6   :  { %v1451_v15 = vpop.permute.xlu0 %1450 }
0x15b7   :  { %1460 = vst.msk [vmem:[#allocation2 + $0x11] sm:$0x1] %vm1342_vm3, %v1451_v15  ;;  %v1453_v23 = vpop.permute.xlu1 %1452 }
0x15b8   :  { %1461 = vst.msk [vmem:[#allocation2 + $0x19] sm:$0x1] %vm1342_vm3, %v1453_v23  ;;  %1784 = vrot.lane.b32.xlu0 %v1771_v18, %s2541_s14  ;;  %v1941_v18 = vrot.slane %v1928_v2, %v2710_v40  ;;  %v1953_v23 = vrot.slane %v1937_v11, %v2710_v40 }
0x15b9   :  { %1790 = vrot.lane.b32.xlu1 %v1783_v44, %s2541_s14  ;;  %v2048_v44 = vrot.slane %v2034_v4, %v2912_v19 }
0x15ba   :  { %v1503_v25 = vpop.permute.xlu0 %1502 }
0x15bb   :  { %1514 = vst.msk [vmem:[#allocation2 + $0x1] sm:$0x1] %vm1400_vm4, %v1503_v25  ;;  %v1505_v31 = vpop.permute.xlu1 %1504  ;;  %v2058_v29 = vrot.slane %v2048_v44, %v2710_v40  ;;  %v2050_v27 = vcombine.high %v2048_v44, %v2048_v44 }
0x15bc   :  { %1515 = vst.msk [vmem:[#allocation2 + $0x9] sm:$0x1] %vm1400_vm4, %v1505_v31  ;;  %1788 = vrot.lane.b32.xlu0 %v1779_v52, %s2541_s14  ;;  %v1949_v52 = vrot.slane %v1936_v55, %v2710_v40 }
0x15bd   :  { %1900 = vrot.lane.b32.xlu1 %v1889_v36, %s2541_s14  ;;  %v2054_v36 = vrot.slane %v2041_v46, %v2710_v40  ;;  %v2066_v35 = vrot.slane %v2050_v27, %v2710_v40 }
0x15be   :  { %v1507_v34 = vpop.permute.xlu0 %1506 }
0x15bf   :  { %1516 = vst.msk [vmem:[#allocation2 + $0x11] sm:$0x1] %vm1400_vm4, %v1507_v34  ;;  %v1509_v37 = vpop.permute.xlu1 %1508  ;;  %v3109_v34 = vrot.slane %v2147_v16, %v2912_v19 }
0x15c0   :  { %1517 = vst.msk [vmem:[#allocation2 + $0x19] sm:$0x1] %vm1400_vm4, %v1509_v37  ;;  %1898 = vrot.lane.b32.xlu0 %v1885_v6, %s2541_s14 }
0x15c1   :  { %1904 = vrot.lane.b32.xlu1 %v1897_v38, %s2541_s14  ;;  %v2171_v38 = vrot.slane %v3109_v34, %v2710_v40  ;;  %v2163_v11 = vcombine.high %v3109_v34, %v3109_v34 }
0x15c2   :  { %v1559_v39 = vpop.permute.xlu0 %1558 }
0x15c3   :  { %1570 = vst.msk [vmem:[#allocation2 + $0x2] sm:$0x1] %vm1342_vm3, %v1559_v39  ;;  %v1561_v45 = vpop.permute.xlu1 %1560  ;;  %v2179_v21 = vrot.slane %v2163_v11, %v2710_v40 }
0x15c4   :  { %1571 = vst.msk [vmem:[#allocation2 + $0xa] sm:$0x1] %vm1342_vm3, %v1561_v45  ;;  %1902 = vrot.lane.b32.xlu0 %v1893_v41, %s2541_s14 }
0x15c5   :  { %2012 = vrot.lane.b32.xlu1 %v2001_v7, %s2541_s14 }
0x15c6   :  { %v1563_v51 = vpop.permute.xlu0 %1562 }
0x15c7   :  { %1572 = vst.msk [vmem:[#allocation2 + $0x12] sm:$0x1] %vm1342_vm3, %v1563_v51  ;;  %v1565_v28 = vpop.permute.xlu1 %1564 }
0x15c8   :  { %1573 = vst.msk [vmem:[#allocation2 + $0x1a] sm:$0x1] %vm1342_vm3, %v1565_v28  ;;  %2010 = vrot.lane.b32.xlu0 %v1997_v22, %s2541_s14 }
0x15c9   :  { %2016 = vrot.lane.b32.xlu1 %v2009_v33, %s2541_s14 }
0x15ca   :  { %v1616_v56 = vpop.permute.xlu0 %1615 }
0x15cb   :  { %1627 = vst.msk [vmem:[#allocation2 + $0x2] sm:$0x1] %vm1400_vm4, %v1616_v56  ;;  %v1618_v58 = vpop.permute.xlu1 %1617 }
0x15cc   :  { %1628 = vst.msk [vmem:[#allocation2 + $0xa] sm:$0x1] %vm1400_vm4, %v1618_v58  ;;  %2014 = vrot.lane.b32.xlu0 %v2005_v57, %s2541_s14 }
0x15cd   :  { %1843 = vrot.lane.b32.xlu1 %v1832_v59, %s2540_s3 }
0x15ce   :  { %v1620_v60 = vpop.permute.xlu0 %1619 }
0x15cf   :  { %1629 = vst.msk [vmem:[#allocation2 + $0x12] sm:$0x1] %vm1400_vm4, %v1620_v60  ;;  %v1622_v20 = vpop.permute.xlu1 %1621 }
0x15d0   :  { %1630 = vst.msk [vmem:[#allocation2 + $0x1a] sm:$0x1] %vm1400_vm4, %v1622_v20  ;;  %1841 = vrot.lane.b32.xlu0 %v1828_v63, %s2540_s3 }
0x15d1   :  { %1847 = vrot.lane.b32.xlu1 %v1840_v1, %s2540_s3 }
0x15d2   :  { %v1673_v48 = vpop.permute.xlu0 %1672 }
0x15d3   :  { %1684 = vst.msk [vmem:[#allocation2 + $0x3] sm:$0x1] %vm1342_vm3, %v1673_v48  ;;  %v1675_v9 = vpop.permute.xlu1 %1674 }
0x15d4   :  { %1685 = vst.msk [vmem:[#allocation2 + $0xb] sm:$0x1] %vm1342_vm3, %v1675_v9  ;;  %1845 = vrot.lane.b32.xlu0 %v1836_v3, %s2540_s3  ;;  %v2162_v3 = vcombine.high %v3117_v43, %v3117_v43 }
0x15d5   :  { %1956 = vrot.lane.b32.xlu1 %v1945_v5, %s2540_s3 }
0x15d6   :  { %v1677_v15 = vpop.permute.xlu0 %1676 }
0x15d7   :  { %1686 = vst.msk [vmem:[#allocation2 + $0x13] sm:$0x1] %vm1342_vm3, %v1677_v15  ;;  %v1679_v8 = vpop.permute.xlu1 %1678 }
0x15d8   :  { %1687 = vst.msk [vmem:[#allocation2 + $0x1b] sm:$0x1] %vm1342_vm3, %v1679_v8  ;;  %1954 = vrot.lane.b32.xlu0 %v1941_v18, %s2540_s3  ;;  %v2175_v18 = vrot.slane %v2162_v3, %v2710_v40 }
0x15d9   :  { %1960 = vrot.lane.b32.xlu1 %v1953_v23, %s2540_s3 }
0x15da   :  { %v1729_v25 = vpop.permute.xlu0 %1728 }
0x15db   :  { %1740 = vst.msk [vmem:[#allocation2 + $0x3] sm:$0x1] %vm1400_vm4, %v1729_v25  ;;  %v1731_v26 = vpop.permute.xlu1 %1730 }
0x15dc   :  { %1741 = vst.msk [vmem:[#allocation2 + $0xb] sm:$0x1] %vm1400_vm4, %v1731_v26  ;;  %1958 = vrot.lane.b32.xlu0 %v1949_v52, %s2540_s3 }
0x15dd   :  { %2069 = vrot.lane.b32.xlu1 %v2058_v29, %s2540_s3 }
0x15de   :  { %v1733_v31 = vpop.permute.xlu0 %1732 }
0x15df   :  { %1742 = vst.msk [vmem:[#allocation2 + $0x13] sm:$0x1] %vm1400_vm4, %v1733_v31  ;;  %v1735_v6 = vpop.permute.xlu1 %1734 }
0x15e0   :  { %1743 = vst.msk [vmem:[#allocation2 + $0x1b] sm:$0x1] %vm1400_vm4, %v1735_v6  ;;  %2067 = vrot.lane.b32.xlu0 %v2054_v36, %s2540_s3 }
0x15e1   :  { %2073 = vrot.lane.b32.xlu1 %v2066_v35, %s2540_s3 }
0x15e3   :  { %v1787_v37 = vpop.permute.xlu1 %1786 }
0x15e4   :  { %1797 = vst.msk [vmem:[#allocation2 + $0xc] sm:$0x1] %vm1342_vm3, %v1787_v37  ;;  %2071 = vrot.lane.b32.xlu0 %v2062_v47, %s2540_s3 }
0x15e5   :  { %2182 = vrot.lane.b32.xlu1 %v2171_v38, %s2540_s3 }
0x15e8   :  { %2180 = vrot.lane.b32.xlu0 %v2167_v32, %s2540_s3 }
0x1626   :  { %v1258_v39 = vpop.permute.xlu0 %1257 }
0x1627   :  { %v1260_v41 = vadd.f32 %v2903_v13, %v1258_v39  ;;  %v1278_v42 = vpop.permute.xlu1 %1277 }
0x1628   :  { %v1280_v12 = vadd.f32 %v2905_v14, %v1278_v42 }
0x1629   :  { %v2083_v45 = vcombine.high %v1260_v41, %v1260_v41  ;;  %1282 = vrot.lane.b32.xlu0 %v1260_v41, %s2541_s14 }
0x162a   :  { %v1347_v7 = vcombine.high %v1280_v12, %v1280_v12  ;;  %v1785_v17 = vpop.permute.xlu0 %1784  ;;  %1286 = vrot.lane.b32.xlu1 %v1280_v12, %s2540_s3 }
0x162b   :  { %v2090_v22 = vrot.slane %v2083_v45, %v2912_v19  ;;  %1796 = vst.msk [vmem:[#allocation2 + $0x4] sm:$0x1] %vm1342_vm3, %v1785_v17  ;;  %v1791_v51 = vpop.permute.xlu1 %1790 }
0x162c   :  { %v1354_v30 = vrot.slane %v1347_v7, %v2912_v19  ;;  %1799 = vst.msk [vmem:[#allocation2 + $0x1c] sm:$0x1] %vm1342_vm3, %v1791_v51 }
0x162d   :  { %v2091_v13 = vcombine.high %v2090_v22, %v2090_v22  ;;  %v2098_v28 = vrot.slane %v2090_v22, %v2912_v19 }
0x162e   :  { %v1355_v14 = vcombine.high %v1354_v30, %v1354_v30  ;;  %v1789_v33 = vpop.permute.xlu0 %1788  ;;  %v1362_v50 = vrot.slane %v1354_v30, %v2912_v19 }
0x162f   :  { %v2105_v54 = vrot.slane %v2091_v13, %v2912_v19  ;;  %1798 = vst.msk [vmem:[#allocation2 + $0x14] sm:$0x1] %vm1342_vm3, %v1789_v33  ;;  %v1901_v56 = vpop.permute.xlu1 %1900  ;;  %v2111_v57 = vrot.slane %v2098_v28, %v2710_v40  ;;  %v2106_v59 = vcombine.high %v2098_v28, %v2098_v28 }
0x1630   :  { %1911 = vst.msk [vmem:[#allocation2 + $0xd] sm:$0x1] %vm1342_vm3, %v1901_v56  ;;  %v1369_v62 = vrot.slane %v1355_v14, %v2912_v19  ;;  %v1375_v60 = vrot.slane %v1362_v50, %v2710_v40  ;;  %v1370_v49 = vcombine.high %v1362_v50, %v1362_v50 }
0x1631   :  { %2124 = vrot.lane.b32.xlu0 %v2111_v57, %s2541_s14  ;;  %v2115_v53 = vrot.slane %v2105_v54, %v2710_v40  ;;  %v2107_v19 = vcombine.high %v2105_v54, %v2105_v54  ;;  %v2119_v20 = vrot.slane %v2106_v59, %v2710_v40 }
0x1632   :  { %v1899_v58 = vpop.permute.xlu0 %1898  ;;  %v1379_v63 = vrot.slane %v1369_v62, %v2710_v40  ;;  %v1371_v2 = vcombine.high %v1369_v62, %v1369_v62  ;;  %v1383_v9 = vrot.slane %v1370_v49, %v2710_v40 }
0x1633   :  { %1910 = vst.msk [vmem:[#allocation2 + $0x5] sm:$0x1] %vm1342_vm3, %v1899_v58  ;;  %2126 = vrot.lane.b32.xlu1 %v2115_v53, %s2541_s14  ;;  %v1905_v61 = vpop.permute.xlu1 %1904  ;;  %v2123_v1 = vrot.slane %v2107_v19, %v2710_v40 }
0x1634   :  { %1913 = vst.msk [vmem:[#allocation2 + $0x1d] sm:$0x1] %vm1342_vm3, %v1905_v61  ;;  %v1387_v5 = vrot.slane %v1371_v2, %v2710_v40 }
0x1635   :  { %1388 = vrot.lane.b32.xlu0 %v1375_v60, %s2540_s3 }
0x1636   :  { %v1903_v0 = vpop.permute.xlu0 %1902 }
0x1637   :  { %1912 = vst.msk [vmem:[#allocation2 + $0x15] sm:$0x1] %vm1342_vm3, %v1903_v0  ;;  %1390 = vrot.lane.b32.xlu1 %v1379_v63, %s2540_s3  ;;  %v2013_v10 = vpop.permute.xlu1 %2012 }
0x1638   :  { %2023 = vst.msk [vmem:[#allocation2 + $0xe] sm:$0x1] %vm1342_vm3, %v2013_v10 }
0x1639   :  { %2128 = vrot.lane.b32.xlu0 %v2119_v20, %s2541_s14 }
0x163a   :  { %v2011_v48 = vpop.permute.xlu0 %2010 }
0x163b   :  { %2022 = vst.msk [vmem:[#allocation2 + $0x6] sm:$0x1] %vm1342_vm3, %v2011_v48  ;;  %2130 = vrot.lane.b32.xlu1 %v2123_v1, %s2541_s14  ;;  %v2017_v4 = vpop.permute.xlu1 %2016 }
0x163c   :  { %2025 = vst.msk [vmem:[#allocation2 + $0x1e] sm:$0x1] %vm1342_vm3, %v2017_v4 }
0x163d   :  { %1392 = vrot.lane.b32.xlu0 %v1383_v9, %s2540_s3 }
0x163e   :  { %v2015_v55 = vpop.permute.xlu0 %2014 }
0x163f   :  { %2024 = vst.msk [vmem:[#allocation2 + $0x16] sm:$0x1] %vm1342_vm3, %v2015_v55  ;;  %1394 = vrot.lane.b32.xlu1 %v1387_v5, %s2540_s3  ;;  %v1844_v15 = vpop.permute.xlu1 %1843 }
0x1640   :  { %1854 = vst.msk [vmem:[#allocation2 + $0xc] sm:$0x1] %vm1400_vm4, %v1844_v15 }
0x1641   :  { %2184 = vrot.lane.b32.xlu0 %v2175_v18, %s2540_s3 }
0x1642   :  { %v1842_v8 = vpop.permute.xlu0 %1841 }
0x1643   :  { %1853 = vst.msk [vmem:[#allocation2 + $0x4] sm:$0x1] %vm1400_vm4, %v1842_v8  ;;  %2186 = vrot.lane.b32.xlu1 %v2179_v21, %s2540_s3  ;;  %v1848_v23 = vpop.permute.xlu1 %1847 }
0x1644   :  { %1856 = vst.msk [vmem:[#allocation2 + $0x1c] sm:$0x1] %vm1400_vm4, %v1848_v23 }
0x1646   :  { %v1846_v44 = vpop.permute.xlu0 %1845 }
0x1647   :  { %1855 = vst.msk [vmem:[#allocation2 + $0x14] sm:$0x1] %vm1400_vm4, %v1846_v44  ;;  %v1957_v46 = vpop.permute.xlu1 %1956 }
0x1648   :  { %1967 = vst.msk [vmem:[#allocation2 + $0xd] sm:$0x1] %vm1400_vm4, %v1957_v46 }
0x164a   :  { %v1955_v25 = vpop.permute.xlu0 %1954 }
0x164b   :  { %1966 = vst.msk [vmem:[#allocation2 + $0x5] sm:$0x1] %vm1400_vm4, %v1955_v25  ;;  %v1961_v52 = vpop.permute.xlu1 %1960 }
0x164c   :  { %1969 = vst.msk [vmem:[#allocation2 + $0x1d] sm:$0x1] %vm1400_vm4, %v1961_v52 }
0x164e   :  { %v1959_v40 = vpop.permute.xlu0 %1958 }
0x164f   :  { %1968 = vst.msk [vmem:[#allocation2 + $0x15] sm:$0x1] %vm1400_vm4, %v1959_v40  ;;  %v2070_v16 = vpop.permute.xlu1 %2069 }
0x1650   :  { %2080 = vst.msk [vmem:[#allocation2 + $0xe] sm:$0x1] %vm1400_vm4, %v2070_v16 }
0x1652   :  { %v2068_v26 = vpop.permute.xlu0 %2067 }
0x1653   :  { %2079 = vst.msk [vmem:[#allocation2 + $0x6] sm:$0x1] %vm1400_vm4, %v2068_v26  ;;  %v2074_v29 = vpop.permute.xlu1 %2073 }
0x1654   :  { %2082 = vst.msk [vmem:[#allocation2 + $0x1e] sm:$0x1] %vm1400_vm4, %v2074_v29 }
0x1656   :  { %v2072_v27 = vpop.permute.xlu0 %2071 }
0x1657   :  { %2081 = vst.msk [vmem:[#allocation2 + $0x16] sm:$0x1] %vm1400_vm4, %v2072_v27  ;;  %v2183_v36 = vpop.permute.xlu1 %2182 }
0x165a   :  { %v2181_v31 = vpop.permute.xlu0 %2180 }
0x169b   :  { %v1283_v24 = vpop.permute.xlu0 %1282 }
0x169c   :  { %v1287_v34 = vpop.permute.xlu1 %1286 }
0x169d   :  { %v1289_v6 = vsel %vm293_vm1, %v1283_v24, %v1287_v34 }
0x169e   :  { %2197 = vst.msk [vmem:[#allocation4 - $0x4] sm:$0xf0] %vm2196_vm5, %v1289_v6 }
0x169f   :  { %2502 = shalt.err (!%p2499_p4)
}
0x16a0   :  { %s2503_s20 = scalar_lea.hbm %s3227_s5, 64 }
0x16a1   :  { %p2504_p5 = scmp.ne.s32.totalorder %s3227_s5, %s2503_s20  ;;  %p2507_p6 = scmp.lt.u32.totalorder %s2503_s20, %s3227_s5 }
0x16a3   :  { %p2509_p7 = pnand %p2507_p6, %p2504_p5 }
0x16a5   :  { %2512 = shalt.err (!%p2509_p7)
}
0x16a6   :  { %2219 = dma.vmem_to_hbm [thread:$0]  %s2217_s16, 64, %s3227_s5, [#allocation5]   ;;  %v2125_v35 = vpop.permute.xlu0 %2124  ;;  %v2127_v43 = vpop.permute.xlu1 %2126 }
0x16a7   :  { %2136 = vst.msk [vmem:[#allocation2 + $0x7] sm:$0x1] %vm1342_vm3, %v2125_v35  ;;  %2137 = vst.msk [vmem:[#allocation2 + $0xf] sm:$0x1] %vm1342_vm3, %v2127_v43  ;;  %s2544_s5 = smov [#allocation2]  }
0x16a8   :  { %2192 = vst.msk [vmem:[#allocation2 + $0x7] sm:$0x1] %vm1400_vm4, %v2181_v31  ;;  %2193 = vst.msk [vmem:[#allocation2 + $0xf] sm:$0x1] %vm1400_vm4, %v2183_v36  ;;  %s2203_s27 = sshll.u32 %s2544_s5, 4  ;;  %s2204_s27 = int_to_ptr.vmem [resolvable:$true] %s2203_s27 }
0x16a9   :  { %s2513_s28 = scalar_lea.vmem %s2204_s27, 512  ;;  %p2518_p9 = scmp.lt.s32.totalorder %s2204_s27, %s2204_s27 }
0x16aa   :  { %v1389_v47 = vpop.permute.xlu0 %1388  ;;  %v1391_v37 = vpop.permute.xlu1 %1390  ;;  %p2514_p8 = scmp.ne.s32.totalorder %s2204_s27, %s2513_s28  ;;  %p2519_p10 = scmp.lt.s32.totalorder %s2513_s28, %s2513_s28 }
0x16ab   :  { %1401 = vst.msk [vmem:[#allocation2] sm:$0x1] %vm1400_vm4, %v1389_v47  ;;  %1402 = vst.msk [vmem:[#allocation2 + $0x8] sm:$0x1] %vm1400_vm4, %v1391_v37 }
0x16ac   :  { %p2520_p11 = por %p2519_p10, %p2518_p9 }
0x16ae   :  { %v2129_v38 = vpop.permute.xlu0 %2128  ;;  %v2131_v32 = vpop.permute.xlu1 %2130  ;;  %p2521_p12 = pnand %p2520_p11, %p2514_p8 }
0x16af   :  { %2138 = vst.msk [vmem:[#allocation2 + $0x17] sm:$0x1] %vm1342_vm3, %v2129_v38  ;;  %2139 = vst.msk [vmem:[#allocation2 + $0x1f] sm:$0x1] %vm1342_vm3, %v2131_v32 }
0x16b2   :  { %v1393_v39 = vpop.permute.xlu0 %1392  ;;  %v1395_v41 = vpop.permute.xlu1 %1394 }
0x16b3   :  { %1403 = vst.msk [vmem:[#allocation2 + $0x10] sm:$0x1] %vm1400_vm4, %v1393_v39  ;;  %1404 = vst.msk [vmem:[#allocation2 + $0x18] sm:$0x1] %vm1400_vm4, %v1395_v41 }
0x16b6   :  { %v2185_v42 = vpop.permute.xlu0 %2184  ;;  %v2187_v12 = vpop.permute.xlu1 %2186 }
0x16b7   :  { %2194 = vst.msk [vmem:[#allocation2 + $0x17] sm:$0x1] %vm1400_vm4, %v2185_v42  ;;  %2195 = vst.msk [vmem:[#allocation2 + $0x1f] sm:$0x1] %vm1400_vm4, %v2187_v12 }
0x16b8   :  { %2524 = shalt.err (!%p2521_p12)
}
0x16b9   :  { %s2525_s6 = scalar_lea.hbm %s3226_s4, 512 }
0x16ba   :  { %p2526_p13 = scmp.ne.s32.totalorder %s3226_s4, %s2525_s6  ;;  %p2529_p0 = scmp.lt.u32.totalorder %s2525_s6, %s3226_s4 }
0x16bc   :  { %p2531_p1 = pnand %p2529_p0, %p2526_p13 }
0x16be   :  { %2534 = shalt.err (!%p2531_p1)
}
0x16bf   :  { %s2545_s10 = smov 128   ;;  %s2546_s11 = smov 8  }
0x16c0   :  { %2209 = dma.vmem_to_hbm [thread:$0]  %s2204_s27, 512, %s3226_s4, [#allocation3], %s2545_s10, %s2545_s10, %s2546_s11  }
0x16c1   :  { %2535 = dma.done.wait [#allocation3], 512  }
0x16c2   :  { %2536 = vsyncadd [#allocation3], 4294966784 }
0x16c3   :  { %2537 = dma.done.wait [#allocation5], 64  }
0x16c4   :  { %2538 = vsyncadd [#allocation5], 4294967232 }
0x16c5   :  { %2226 = vsyncpa [#allocation3], 1 }
0x16c6   :  { %2227 = vsyncpa [#allocation5], 1 }

</bundles_post_ra>
